<compile_context>
chip_gen: v6e
topology: v6e:2x2x1
jax: 0.10.0
libtpu: 0.0.40
codegen_flags: <defaults>
</compile_context>

<pallas_src>
import math

import jax
import jax.numpy as jnp
from jax.experimental import pallas as pl
from jax.experimental.pallas import tpu as pltpu


# ------------------------------ small helpers -------------------------------

def _round_up(v, m):
    return ((v + m - 1) // m) * m


def _pad2(a, rows, cols):
    return jnp.pad(a, ((0, rows - a.shape[0]), (0, cols - a.shape[1])))


_VMEM_LIMIT = 48 * 1024 * 1024
# NOTE(gen-tuning): on v5e/v6e (128 MiB VMEM) raise vmem_limit_bytes toward ~96 MiB and
# grow tm/tk toward 1024/2048+; on v7x (64 MiB, 2 TCs) keep <= ~48-56 MiB and prefer
# growing tm over tk.  The "parallel" row axis is what shards across v7x's 2 TensorCores.

_COMPILER_PARAMS_CONV = pltpu.CompilerParams(
    dimension_semantics=("parallel", "arbitrary"),
    vmem_limit_bytes=_VMEM_LIMIT,
)
_COMPILER_PARAMS_HEAD = pltpu.CompilerParams(
    dimension_semantics=("arbitrary",),
    vmem_limit_bytes=_VMEM_LIMIT,
)


# ----------------------------- SAGEConv kernel -------------------------------

def _make_sage_kernel(cin_p, deg_col=None):
    """Tiled SAGEConv + bias + ReLU; A@x accumulated over the K (neighbor) grid axis.

    deg_col is not None -> conv-1 variant:
        * x carries a ones-column at `deg_col`, so acc[:, deg_col] == row-sum(A) == deg
          (the degree rides the same MXU pass as A@x: no extra HBM pass / XLU reduce).
        * aux input is p; the stored output is relu(conv) * p (bf16) so conv2 consumes it
          directly, and inv_deg is emitted as a second output for conv2 to reuse.
    deg_col is None     -> conv-2 variant: aux input is the precomputed inv_deg.
    """
    conv1 = deg_col is not None

    def kernel(a_ref, xk_ref, xi_ref, aux_ref, w_ref, b_ref, *rest):
        if conv1:
            h_ref, invdeg_ref, acc_ref = rest
        else:
            h_ref, acc_ref = rest
        k = pl.program_id(1)

        @pl.when(k == 0)
        def _init():
            acc_ref[...] = jnp.zeros_like(acc_ref)

        # A is int8 in HBM; upcast the streamed tile in VMEM (hides under the DMA) and
        # run the neighbor sum on the bf16 MXU path with f32 accumulation.
        a_bf = a_ref[...].astype(jnp.float32).astype(jnp.bfloat16)
        acc_ref[...] += jnp.dot(a_bf, xk_ref[...],
                                preferred_element_type=jnp.float32)

        @pl.when(k == pl.num_programs(1) - 1)
        def _finalize():
            acc = acc_ref[...]
            if conv1:
                # degree = the ones-column of acc (exact: 0/1 summed in f32 on the MXU)
                lane = jax.lax.broadcasted_iota(jnp.int32, acc.shape, 1)
                deg = jnp.sum(jnp.where(lane == deg_col, acc, 0.0),
                              axis=1, keepdims=True)
                inv_deg = 1.0 / jnp.maximum(deg, 1.0)
            else:
                inv_deg = aux_ref[...]
            agg = (acc * inv_deg).astype(jnp.bfloat16)            # mean aggregation
            # two-dot projection (no concat copy); bf16 operands, f32 accumulation
            out = jnp.dot(agg, w_ref[:cin_p, :], preferred_element_type=jnp.float32)
            out = out + jnp.dot(xi_ref[...], w_ref[cin_p:, :],
                                preferred_element_type=jnp.float32)
            out = jnp.maximum(out + b_ref[...], 0.0)              # bias + fused relu_()
            if conv1:
                # fold the next layer's `x *= p` and the bf16 recast into this store
                h_ref[...] = (out * aux_ref[...]).astype(h_ref.dtype)
                invdeg_ref[...] = inv_deg
            else:
                h_ref[...] = out.astype(h_ref.dtype)

    return kernel


def sage_conv(x_bf, a_i8, aux_col, w, b, *, tm, tk, deg_col=None):
    """out = relu( (A @ x / deg) @ W_l + b_l + x @ W_r )  [conv1: * p], tiled (rows, K)."""
    n_pad, cin_p = x_bf.shape
    hp = w.shape[1]
    assert w.shape[0] == 2 * cin_p
    assert n_pad % tm == 0 and n_pad % tk == 0
    conv1 = deg_col is not None

    out_shape = (jax.ShapeDtypeStruct((n_pad, hp), jnp.bfloat16),)
    out_specs = (pl.BlockSpec((tm, hp), lambda i, k: (i, 0)),)
    if conv1:
        out_shape += (jax.ShapeDtypeStruct((n_pad, 1), jnp.float32),)
        out_specs += (pl.BlockSpec((tm, 1), lambda i, k: (i, 0)),)

    res = pl.pallas_call(
        _make_sage_kernel(cin_p, deg_col),
        out_shape=out_shape,
        grid_spec=pltpu.PrefetchScalarGridSpec(
            num_scalar_prefetch=0,
            grid=(n_pad // tm, n_pad // tk),
            in_specs=[
                pl.BlockSpec((tm, tk), lambda i, k: (i, k)),          # A tile (int8)
                pl.BlockSpec((tk, cin_p), lambda i, k: (k, 0)),       # neighbor feats (bf16)
                pl.BlockSpec((tm, cin_p), lambda i, k: (i, 0)),       # self feats (bf16)
                pl.BlockSpec((tm, 1), lambda i, k: (i, 0)),           # p (conv1) / 1/deg (conv2)
                pl.BlockSpec((2 * cin_p, hp), lambda i, k: (0, 0)),   # [W_l; W_r] (bf16)
                pl.BlockSpec((1, hp), lambda i, k: (0, 0)),           # bias (f32)
            ],
            out_specs=out_specs,
            scratch_shapes=[pltpu.VMEM((tm, cin_p), jnp.float32)],    # f32 A@x accumulator
        ),
        compiler_params=_COMPILER_PARAMS_CONV,
    )(a_i8, x_bf, x_bf, aux_col, w, b)
    return res if conv1 else res[0]


# -------------------------------- head kernel --------------------------------

def _head_kernel(x_ref, p_ref, batch_ref, root_ref, w_ref, b_ref, o_ref,
                 pool_acc, cnt_acc, root_acc):
    """grid = (node tiles,).  Per tile: segment-sum pooling and root-row gather are both
    (B_pad, tn) one-hot matmuls against the same x tile (x read once, reductions on the
    MXU).  Finalize: mean, two-dot head linear, lane-dense (B_pad, op) store."""
    k = pl.program_id(0)
    tn = x_ref.shape[0]
    b_pad, hp = pool_acc.shape

    @pl.when(k == 0)
    def _init():
        pool_acc[...] = jnp.zeros_like(pool_acc)
        cnt_acc[...] = jnp.zeros_like(cnt_acc)
        root_acc[...] = jnp.zeros_like(root_acc)

    x_bf = x_ref[...]                                                 # (tn, hp) bf16
    batch_row = batch_ref[...]                                        # (1, tn) int32
    graph_ids = jax.lax.broadcasted_iota(jnp.int32, (b_pad, tn), 0)
    member = (graph_ids == batch_row).astype(jnp.float32)             # (b_pad, tn)
    pool_mask = (member * p_ref[...]).astype(jnp.bfloat16)            # fold p into the mask
    pool_acc[...] += jnp.dot(pool_mask, x_bf, preferred_element_type=jnp.float32)
    cnt_acc[...] += jnp.sum(member, axis=1, keepdims=True)

    col_ids = k * tn + jax.lax.broadcasted_iota(jnp.int32, (b_pad, tn), 1)
    root_mask = (col_ids == root_ref[...]).astype(jnp.float32).astype(jnp.bfloat16)
    root_acc[...] += jnp.dot(root_mask, x_bf, preferred_element_type=jnp.float32)

    @pl.when(k == pl.num_programs(0) - 1)
    def _finalize():
        pooled = pool_acc[...] / jnp.maximum(cnt_acc[...], 1.0)       # (b_pad, hp)
        out = jnp.dot(root_acc[...], w_ref[:hp, :], preferred_element_type=jnp.float32)
        out = out + jnp.dot(pooled, w_ref[hp:, :], preferred_element_type=jnp.float32)
        o_ref[...] = out + b_ref[...]


def gnn_head(h, p_row, batch_row, root_col, w_head, b_head, *, tn):
    n_pad, hp = h.shape
    b_pad = root_col.shape[0]
    op = w_head.shape[1]
    assert w_head.shape[0] == 2 * hp
    assert n_pad % tn == 0

    return pl.pallas_call(
        _head_kernel,
        out_shape=jax.ShapeDtypeStruct((b_pad, op), jnp.float32),
        grid_spec=pltpu.PrefetchScalarGridSpec(
            num_scalar_prefetch=0,
            grid=(n_pad // tn,),
            in_specs=[
                pl.BlockSpec((tn, hp), lambda k: (k, 0)),          # h2 tile (bf16)
                pl.BlockSpec((1, tn), lambda k: (0, k)),           # p row (f32)
                pl.BlockSpec((1, tn), lambda k: (0, k)),           # batch row (int32)
                pl.BlockSpec((b_pad, 1), lambda k: (0, 0)),        # root_ptr (int32)
                pl.BlockSpec((2 * hp, op), lambda k: (0, 0)),      # [W_root; W_pool] (f32)
                pl.BlockSpec((1, op), lambda k: (0, 0)),           # bias (f32)
            ],
            out_specs=pl.BlockSpec((b_pad, op), lambda k: (0, 0)),
            scratch_shapes=[pltpu.VMEM((b_pad, hp), jnp.float32),   # pooled sums
                            pltpu.VMEM((b_pad, 1), jnp.float32),    # node counts
                            pltpu.VMEM((b_pad, hp), jnp.float32)],  # root rows
        ),
        compiler_params=_COMPILER_PARAMS_HEAD,
    )(h, p_row, batch_row, root_col, w_head, b_head)


# --------------------------------- forward -----------------------------------

def gnn_forward(params, x, adj, root_ptr, p, batch, num_graphs, *,
                tm=512, tk=512, tn=512):
    n, in_ch = x.shape
    hid = params["w1_l"].shape[1]
    out_ch = params["w_lin"].shape[1]

    # tiles are multiples of 256 (covers the (8/16/32, 128) layout constraints for
    # f32 / bf16 / int8 operands); N is padded so every grid is exact.
    tm = _round_up(max(tm, 256), 256)
    tk = _round_up(max(tk, 256), 256)
    tn = _round_up(max(tn, 256), 256)
    n_small = _round_up(n, 256)
    tm, tk, tn = min(tm, n_small), min(tk, n_small), min(tn, n_small)
    n_pad = _round_up(n, math.lcm(tm, tk, tn))

    cin_p = _round_up(in_ch + 1, 128)   # +1 spare lane carries the degree ones-column
    hp = _round_up(hid, 128)            # lane-dense hidden width
    op = _round_up(out_ch, 128)         # lane-dense head output width
    b_pad = _round_up(max(num_graphs, 1), 8)

    # adjacency: stored once as int8 in HBM (0/1 mask -> lossless), shared by both convs
    a_i8 = jnp.pad(adj.astype(jnp.int8), ((0, n_pad - n), (0, n_pad - n)))

    # node features: zero-pad rows/lanes, plant the degree ones-column, cast to bf16
    x_p = jnp.zeros((n_pad, cin_p), jnp.float32)
    x_p = x_p.at[:n, :in_ch].set(x.astype(jnp.float32))
    x_p = x_p.at[:, in_ch].set(1.0)
    x_bf = x_p.astype(jnp.bfloat16)

    p_col = jnp.pad(p.astype(jnp.float32), (0, n_pad - n)).reshape(n_pad, 1)
    p_row = p_col.reshape(1, n_pad)
    batch_row = jnp.pad(batch.astype(jnp.int32), (0, n_pad - n),
                        constant_values=-1).reshape(1, n_pad)   # -1: padded nodes pool nowhere
    root_col = jnp.pad(root_ptr.astype(jnp.int32),
                       (0, b_pad - num_graphs)).reshape(b_pad, 1)

    # zero-padded, stacked weights (bf16 for the conv projections, f32 for the tiny head)
    w1 = jnp.concatenate([_pad2(params["w1_l"], cin_p, hp),
                          _pad2(params["w1_r"], cin_p, hp)], axis=0).astype(jnp.bfloat16)
    b1 = _pad2(params["b1_l"], 1, hp)
    w2 = jnp.concatenate([_pad2(params["w2_l"], hp, hp),
                          _pad2(params["w2_r"], hp, hp)], axis=0).astype(jnp.bfloat16)
    b2 = _pad2(params["b2_l"], 1, hp)
    w_head = jnp.concatenate([_pad2(params["w_lin"][:hid], hp, op),
                              _pad2(params["w_lin"][hid:], hp, op)], axis=0)
    b_head = _pad2(params["b_lin"], 1, op)

    # conv1: computes inv_deg on the fly, emits relu(conv1)*p in bf16 (conv2's input)
    h1p, inv_deg = sage_conv(x_bf, a_i8, p_col, w1, b1, tm=tm, tk=tk, deg_col=in_ch)
    # conv2: reuses inv_deg, emits h2 in bf16 for the head
    h2 = sage_conv(h1p, a_i8, inv_deg, w2, b2, tm=tm, tk=tk)

    out = gnn_head(h2, p_row, batch_row, root_col, w_head, b_head, tn=tn)
    return out[:num_graphs, :out_ch]   # strip graph/lane padding


# --------------------------- pure-JAX reference -------------------------------

def gnn_reference(params, x, adj, root_ptr, p, batch, num_graphs):
    def sage(x, wl, bl, wr):
        deg = jnp.maximum(jnp.sum(adj, axis=1, keepdims=True), 1.0)
        agg = (adj @ x) / deg
        return jnp.maximum(agg @ wl + bl + x @ wr, 0.0)

    h = sage(x, params["w1_l"], params["b1_l"], params["w1_r"])
    h = sage(h * p[:, None], params["w2_l"], params["b2_l"], params["w2_r"])
    xr = h[root_ptr]
    onehot = (batch[None, :] == jnp.arange(num_graphs)[:, None]).astype(jnp.float32)
    cnt = jnp.maximum(onehot.sum(axis=1, keepdims=True), 1.0)
    pooled = (onehot @ (h * p[:, None])) / cnt
    feat = jnp.concatenate([xr, pooled], axis=-1)
    return feat @ params["w_lin"] + params["b_lin"]


# ------------------------ deterministic param init ----------------------------

def init_params(key, in_ch, hid_ch, out_ch):
    def linear_init(k, fan_in, fan_out, bias):
        kw, kb = jax.random.split(k)
        bound = 1.0 / jnp.sqrt(float(fan_in))
        w = jax.random.uniform(kw, (fan_in, fan_out), jnp.float32, -bound, bound)
        b = (jax.random.uniform(kb, (1, fan_out), jnp.float32, -bound, bound)
             if bias else jnp.zeros((1, fan_out), jnp.float32))
        return w, b

    ks = jax.random.split(key, 5)
    w1_l, b1_l = linear_init(ks[0], in_ch, hid_ch, bias=True)    # SAGEConv.lin_l
    w1_r, _ = linear_init(ks[1], in_ch, hid_ch, bias=False)      # SAGEConv.lin_r
    w2_l, b2_l = linear_init(ks[2], hid_ch, hid_ch, bias=True)
    w2_r, _ = linear_init(ks[3], hid_ch, hid_ch, bias=False)
    w_lin, b_lin = linear_init(ks[4], 2 * hid_ch, out_ch, bias=True)
    return dict(w1_l=w1_l, b1_l=b1_l, w1_r=w1_r,
                w2_l=w2_l, b2_l=b2_l, w2_r=w2_r,
                w_lin=w_lin, b_lin=b_lin)


# ----------------------------------- main --------------------------------------

if __name__ == "__main__":
    key = jax.random.PRNGKey(0)
    IN_CH, HID_CH, OUT_CH = 8, 32, 4
    NUM_GRAPHS, NODES_PER_GRAPH = 2, 256
    N = NUM_GRAPHS * NODES_PER_GRAPH

    k_x, k_a, k_p, k_w = jax.random.split(key, 4)

    # node features
    x = jax.random.normal(k_x, (N, IN_CH), jnp.float32)

    # dense block-diagonal adjacency (adj_t: row i = incoming edges of node i),
    # with self-loops so degree >= 1
    a = (jax.random.uniform(k_a, (N, N)) < 0.1).astype(jnp.float32)
    graph_of = jnp.repeat(jnp.arange(NUM_GRAPHS), NODES_PER_GRAPH)
    same_graph = (graph_of[:, None] == graph_of[None, :]).astype(jnp.float32)
    adj = jnp.maximum(a * same_graph, jnp.eye(N, dtype=jnp.float32))

    # per-node scalar p, root pointers, batch assignment
    p = jax.random.uniform(k_p, (N,), jnp.float32, 0.1, 1.0)
    root_ptr = jnp.array([0, NODES_PER_GRAPH], dtype=jnp.int32)
    batch = graph_of.astype(jnp.int32)

    params = init_params(k_w, IN_CH, HID_CH, OUT_CH)

    # small tiles so the (row, K) accumulator grid and the head's node-tile reduction are
    # actually exercised; for real graph sizes raise toward the 512 defaults (and larger
    # still on v5e/v6e's 128 MiB VMEM).
    out = gnn_forward(params, x, adj, root_ptr, p, batch, NUM_GRAPHS,
                      tm=256, tk=256, tn=256)
    out = jax.block_until_ready(out)
    assert out.shape == (NUM_GRAPHS, OUT_CH)

    ref = gnn_reference(params, x, adj, root_ptr, p, batch, NUM_GRAPHS)
    if not jnp.allclose(out, ref, rtol=5e-2, atol=5e-2):
        raise AssertionError("Pallas GNN output mismatch vs pure-JAX reference")

    print("KERNEL_OK")
</pallas_src>

<mosaic_0001>
module attributes {stable_mosaic.version = 11 : i64} {
  func.func @kernel(%arg0: i32, %arg1: i32, %arg2: memref<256x256xi8, #tpu.memory_space<vmem>>, %arg3: memref<256x128xbf16, #tpu.memory_space<vmem>>, %arg4: memref<256x128xbf16, #tpu.memory_space<vmem>>, %arg5: memref<256x1xf32, #tpu.memory_space<vmem>>, %arg6: memref<256x128xbf16, #tpu.memory_space<vmem>>, %arg7: memref<1x128xf32, #tpu.memory_space<vmem>>, %arg8: memref<256x128xbf16, #tpu.memory_space<vmem>>, %arg9: memref<256x1xf32, #tpu.memory_space<vmem>>, %arg10: memref<256x128xf32, #tpu.memory_space<vmem>>) attributes {dimension_semantics = [#tpu.dimension_semantics<parallel>, #tpu.dimension_semantics<arbitrary>], iteration_bounds = array<i64: 2, 2>, scalar_prefetch = 0 : i64, scratch_operands = 1 : i64, tpu.core_type = #tpu.core_type<tc>, window_params = [{transform_indices = @transform_0, window_bounds = array<i64: 256, 256>}, {transform_indices = @transform_1, window_bounds = array<i64: 256, 128>}, {transform_indices = @transform_2, window_bounds = array<i64: 256, 128>}, {transform_indices = @transform_3, window_bounds = array<i64: 256, 1>}, {pipeline_mode = #tpu.pipeline_mode<synchronous>, transform_indices = @transform_4, window_bounds = array<i64: 256, 128>}, {pipeline_mode = #tpu.pipeline_mode<synchronous>, transform_indices = @transform_5, window_bounds = array<i64: 1, 128>}, {transform_indices = @transform_6, window_bounds = array<i64: 256, 128>}, {transform_indices = @transform_7, window_bounds = array<i64: 256, 1>}]} {
    %c0_i32 = arith.constant 0 : i32
    %0 = arith.cmpi eq, %arg1, %c0_i32 : i32
    %1 = arith.extui %0 : i1 to i32
    %c0_i32_0 = arith.constant 0 : i32
    %2 = arith.cmpi ne, %1, %c0_i32_0 : i32
    scf.if %2 {
      %cst_9 = arith.constant 0.000000e+00 : f32
      %14 = vector.broadcast %cst_9 : f32 to vector<256x128xf32>
      %c0_10 = arith.constant 0 : index
      %c0_11 = arith.constant 0 : index
      %15 = vector.load %arg10[%c0_10, %c0_11] : memref<256x128xf32, #tpu.memory_space<vmem>>, vector<256x128xf32>
      tpu.vector_store %arg10[%c0_10, %c0_11], %14 {strides = array<i32>} : memref<256x128xf32, #tpu.memory_space<vmem>>, vector<256x128xf32>,
    } else {
    }
    %c0 = arith.constant 0 : index
    %c0_1 = arith.constant 0 : index
    %3 = vector.load %arg2[%c0, %c0_1] : memref<256x256xi8, #tpu.memory_space<vmem>>, vector<256x256xi8>
    %4 = arith.sitofp %3 : vector<256x256xi8> to vector<256x256xf32>
    %5 = arith.truncf %4 : vector<256x256xf32> to vector<256x256xbf16>
    %c0_2 = arith.constant 0 : index
    %c0_3 = arith.constant 0 : index
    %6 = vector.load %arg10[%c0_2, %c0_3] : memref<256x128xf32, #tpu.memory_space<vmem>>, vector<256x128xf32>
    %c0_4 = arith.constant 0 : index
    %c0_5 = arith.constant 0 : index
    %7 = vector.load %arg3[%c0_4, %c0_5] : memref<256x128xbf16, #tpu.memory_space<vmem>>, vector<256x128xbf16>
    %cst = arith.constant dense<0.000000e+00> : vector<256x128xf32>
    %8 = tpu.matmul %5, %7, %cst {dimension_numbers = #tpu.dot_dimension_numbers<[1], [0], [0], [1], [0, 0, 1, 1], [], []>} : vector<256x256xbf16>, vector<256x128xbf16>, vector<256x128xf32> -> vector<256x128xf32>
    %9 = arith.addf %6, %8 : vector<256x128xf32>
    %c0_6 = arith.constant 0 : index
    %c0_7 = arith.constant 0 : index
    %10 = vector.load %arg10[%c0_6, %c0_7] : memref<256x128xf32, #tpu.memory_space<vmem>>, vector<256x128xf32>
    tpu.vector_store %arg10[%c0_6, %c0_7], %9 {strides = array<i32>} : memref<256x128xf32, #tpu.memory_space<vmem>>, vector<256x128xf32>,
    %c1_i32 = arith.constant 1 : i32
    %11 = arith.cmpi eq, %arg1, %c1_i32 : i32
    %12 = arith.extui %11 : i1 to i32
    %c0_i32_8 = arith.constant 0 : i32
    %13 = arith.cmpi ne, %12, %c0_i32_8 : i32
    scf.if %13 {
      %c0_9 = arith.constant 0 : index
      %c0_10 = arith.constant 0 : index
      %14 = vector.load %arg10[%c0_9, %c0_10] : memref<256x128xf32, #tpu.memory_space<vmem>>, vector<256x128xf32>
      %15 = tpu.iota {dimensions = array<i32: 1>} : vector<256x128xi32>
      %c8_i32 = arith.constant 8 : i32
      %16 = vector.broadcast %c8_i32 : i32 to vector<256x128xi32>
      %17 = arith.cmpi eq, %15, %16 : vector<256x128xi32>
      %cst_11 = arith.constant 0.000000e+00 : f32
      %18 = vector.broadcast %cst_11 : f32 to vector<256x128xf32>
      %19 = arith.select %17, %14, %18 : vector<256x128xi1>, vector<256x128xf32>
      %cst_12 = arith.constant dense<0.000000e+00> : vector<256xf32>
      %20 = vector.multi_reduction <add>, %19, %cst_12 [1] : vector<256x128xf32> to vector<256xf32>
      %21 = vector.shape_cast %20 : vector<256xf32> to vector<256x1xf32>
      %cst_13 = arith.constant 1.000000e+00 : f32
      %22 = vector.broadcast %cst_13 : f32 to vector<256x1xf32>
      %23 = arith.maximumf %21, %22 : vector<256x1xf32>
      %cst_14 = arith.constant 1.000000e+00 : f32
      %24 = vector.broadcast %cst_14 : f32 to vector<256x1xf32>
      %25 = arith.divf %24, %23 : vector<256x1xf32>
      %26 = vector.broadcast %25 : vector<256x1xf32> to vector<256x128xf32>
      %27 = arith.mulf %14, %26 : vector<256x128xf32>
      %28 = arith.truncf %27 : vector<256x128xf32> to vector<256x128xbf16>
      %c0_15 = arith.constant 0 : index
      %c0_16 = arith.constant 0 : index
      %29 = vector.load %arg6[%c0_15, %c0_16] : memref<256x128xbf16, #tpu.memory_space<vmem>>, vector<128x128xbf16>
      %cst_17 = arith.constant dense<0.000000e+00> : vector<256x128xf32>
      %30 = tpu.matmul %28, %29, %cst_17 {dimension_numbers = #tpu.dot_dimension_numbers<[1], [0], [0], [1], [0, 0, 1, 1], [], []>} : vector<256x128xbf16>, vector<128x128xbf16>, vector<256x128xf32> -> vector<256x128xf32>
      %c0_18 = arith.constant 0 : index
      %c0_19 = arith.constant 0 : index
      %31 = vector.load %arg4[%c0_18, %c0_19] : memref<256x128xbf16, #tpu.memory_space<vmem>>, vector<256x128xbf16>
      %c128 = arith.constant 128 : index
      %c0_20 = arith.constant 0 : index
      %32 = vector.load %arg6[%c128, %c0_20] : memref<256x128xbf16, #tpu.memory_space<vmem>>, vector<128x128xbf16>
      %cst_21 = arith.constant dense<0.000000e+00> : vector<256x128xf32>
      %33 = tpu.matmul %31, %32, %cst_21 {dimension_numbers = #tpu.dot_dimension_numbers<[1], [0], [0], [1], [0, 0, 1, 1], [], []>} : vector<256x128xbf16>, vector<128x128xbf16>, vector<256x128xf32> -> vector<256x128xf32>
      %34 = arith.addf %30, %33 : vector<256x128xf32>
      %c0_22 = arith.constant 0 : index
      %c0_23 = arith.constant 0 : index
      %35 = vector.load %arg7[%c0_22, %c0_23] : memref<1x128xf32, #tpu.memory_space<vmem>>, vector<1x128xf32>
      %36 = vector.broadcast %35 : vector<1x128xf32> to vector<256x128xf32>
      %37 = arith.addf %34, %36 : vector<256x128xf32>
      %cst_24 = arith.constant 0.000000e+00 : f32
      %38 = vector.broadcast %cst_24 : f32 to vector<256x128xf32>
      %39 = arith.maximumf %37, %38 : vector<256x128xf32>
      %c0_25 = arith.constant 0 : index
      %c0_26 = arith.constant 0 : index
      %40 = vector.load %arg5[%c0_25, %c0_26] : memref<256x1xf32, #tpu.memory_space<vmem>>, vector<256x1xf32>
      %41 = vector.broadcast %40 : vector<256x1xf32> to vector<256x128xf32>
      %42 = arith.mulf %39, %41 : vector<256x128xf32>
      %43 = arith.truncf %42 : vector<256x128xf32> to vector<256x128xbf16>
      %c0_27 = arith.constant 0 : index
      %c0_28 = arith.constant 0 : index
      %44 = vector.load %arg8[%c0_27, %c0_28] : memref<256x128xbf16, #tpu.memory_space<vmem>>, vector<256x128xbf16>
      tpu.vector_store %arg8[%c0_27, %c0_28], %43 {strides = array<i32>} : memref<256x128xbf16, #tpu.memory_space<vmem>>, vector<256x128xbf16>,
      %c0_29 = arith.constant 0 : index
      %c0_30 = arith.constant 0 : index
      %45 = vector.load %arg9[%c0_29, %c0_30] : memref<256x1xf32, #tpu.memory_space<vmem>>, vector<256x1xf32>
      tpu.vector_store %arg9[%c0_29, %c0_30], %25 {strides = array<i32>} : memref<256x1xf32, #tpu.memory_space<vmem>>, vector<256x1xf32>,
    } else {
    }
    return
  }
  func.func @transform_0(%arg0: i32, %arg1: i32) -> (i32, i32) {
    %c0_i32 = arith.constant 0 : i32
    return %arg0, %arg1 : i32, i32
  }
  func.func @transform_1(%arg0: i32, %arg1: i32) -> (i32, i32) {
    %c0_i32 = arith.constant 0 : i32
    %c0_i32_0 = arith.constant 0 : i32
    return %arg1, %c0_i32 : i32, i32
  }
  func.func @transform_2(%arg0: i32, %arg1: i32) -> (i32, i32) {
    %c0_i32 = arith.constant 0 : i32
    %c0_i32_0 = arith.constant 0 : i32
    return %arg0, %c0_i32 : i32, i32
  }
  func.func @transform_3(%arg0: i32, %arg1: i32) -> (i32, i32) {
    %c0_i32 = arith.constant 0 : i32
    %c0_i32_0 = arith.constant 0 : i32
    return %arg0, %c0_i32 : i32, i32
  }
  func.func @transform_4(%arg0: i32, %arg1: i32) -> (i32, i32) {
    %c0_i32 = arith.constant 0 : i32
    %c0_i32_0 = arith.constant 0 : i32
    %c0_i32_1 = arith.constant 0 : i32
    return %c0_i32, %c0_i32_0 : i32, i32
  }
  func.func @transform_5(%arg0: i32, %arg1: i32) -> (i32, i32) {
    %c0_i32 = arith.constant 0 : i32
    %c0_i32_0 = arith.constant 0 : i32
    %c0_i32_1 = arith.constant 0 : i32
    return %c0_i32, %c0_i32_0 : i32, i32
  }
  func.func @transform_6(%arg0: i32, %arg1: i32) -> (i32, i32) {
    %c0_i32 = arith.constant 0 : i32
    %c0_i32_0 = arith.constant 0 : i32
    return %arg0, %c0_i32 : i32, i32
  }
  func.func @transform_7(%arg0: i32, %arg1: i32) -> (i32, i32) {
    %c0_i32 = arith.constant 0 : i32
    %c0_i32_0 = arith.constant 0 : i32
    return %arg0, %c0_i32 : i32, i32
  }
}

</mosaic_0001>

<bundles_post_ra>
// kernel: tpu_custom_call.1
= control target key start
LH: loop header
LB: loop body
LE: loop exit
PB: predicated region body
PF: predicated region fallthrough
CT: control target
= control target key end

     0   :  { %s4336_s0 = inlined_call_operand.vmem [shape: s8[512,512], index: 0, kind: input, shape index: {}]   ;;  %s4337_s1 = inlined_call_operand.hbm [shape: bf16[512,128], index: 1, kind: input, shape index: {}]   ;;  %s4338_s2 = inlined_call_operand.hbm [shape: bf16[512,128], index: 2, kind: input, shape index: {}]   ;;  %s4339_s3 = inlined_call_operand.vmem [shape: f32[512,1], index: 3, kind: input, shape index: {}]   ;;  %s4340_s4 = inlined_call_operand.hbm [shape: bf16[256,128], index: 4, kind: input, shape index: {}]   ;;  %s4341_s5 = inlined_call_operand.vmem [shape: f32[1,128], index: 5, kind: input, shape index: {}]   ;;  %s4342_s6 = inlined_call_operand.hbm [shape: bf16[512,128], index: 6, kind: output, shape index: {0}]   ;;  %s4343_s7 = inlined_call_operand.vmem [shape: f32[512,1], index: 7, kind: output, shape index: {1}]  }
   0x1   :  { %4361 = sst [smem:[#allocation27_spill]] %s4336_s0 }
   0x2   :  { %4362 = sst [smem:[#allocation28_spill]] %s4337_s1 }
   0x3   :  { %4363 = sst [smem:[#allocation29_spill]] %s4339_s3 }
   0x4   :  { %4364 = sst [smem:[#allocation30_spill]] %s4340_s4 }
   0x5   :  { %4365 = sst [smem:[#allocation31_spill]] %s4341_s5 }
   0x6   :  { %4366 = sst [smem:[#allocation32_spill]] %s4342_s6 }
   0x7   :  { %4367 = sst [smem:[#allocation33_spill]] %s4343_s7 }
   0x8   :  { %13 = vsyncpa [#allocation5], 0 }
   0x9   :  { %15 = vsyncpa [#allocation5 + $0x1], 0 }
   0xa   :  { %16 = vsyncpa [#allocation8], 0 }
   0xb   :  { %18 = vsyncpa [#allocation8 + $0x1], 0 }
   0xc   :  { %19 = vsyncpa [#allocation6], 0 }
   0xd   :  { %21 = vsyncpa [#allocation6 + $0x1], 0  ;;  %s3532_s24 = smov 0   ;;  %s3534_s25 = smov 0  }
   0xe   :  { %s3536_s26 = smov 0   ;;  %s3538_s27 = smov 0  }
   0xf   :  { %s3540_s28 = smov 0   ;;  %s3542_s29 = smov 0  }
  0x10   :  { %s3544_s30 = smov 0   ;;  %s3546_s8 = smov 0  }
  0x11   :  { %s3548_s9 = smov 0   ;;  %s3550_s10 = smov 0  }
  0x12   :  { %s3552_s11 = smov 0   ;;  %s3554_s12 = smov 0  }
  0x13   :  { %s3556_s13 = smov 0  }
  0x14 LB: > { %4368 = sst [smem:[#allocation15_spill]] %s3430_s24  ;;  %s3598_s14 = sadd.s32 4294967295, %s3478_s13   ;;  %s3478_s13 = sphi %s3556_s13, %s27_s13   ;;  %s3474_s12 = sphi %s3554_s12, %s4433_s12   ;;  %s3470_s11 = sphi %s3552_s11, %s4432_s11   ;;  %s3466_s10 = sphi %s3550_s10, %s4431_s10   ;;  %s3462_s9 = sphi %s3548_s9, %s4430_s9   ;;  %s3458_s8 = sphi %s3546_s8, %s4429_s8   ;;  %s3454_s30 = sphi %s3544_s30, %s4428_s30   ;;  %s3450_s29 = sphi %s3542_s29, %s4427_s29   ;;  %s3446_s28 = sphi %s3540_s28, %s4426_s28   ;;  %s3442_s27 = sphi %s3538_s27, %s4425_s27   ;;  %s3438_s26 = sphi %s3536_s26, %s4424_s26   ;;  %s3434_s25 = sphi %s3534_s25, %s4423_s25   ;;  %s3430_s24 = sphi %s3532_s24, %s4416_s24  }
  0x15   : > { %4369 = sst [smem:[#allocation16_spill]] %s3434_s25  ;;  %s36_s16 = sadd.s32 1, %s3470_s11 }
  0x16   : > { %4370 = sst [smem:[#allocation17_spill]] %s3462_s9  ;;  %s39_s17 = sadd.s32 1, %s3474_s12 }
  0x17   : > { %4371 = sst [smem:[#allocation18_spill]] %s3466_s10  ;;  %p37_p0 = scmp.ge.s32.totalorder %s36_s16, 2 }
  0x18   : > { %s48_s18 = sadd.s32 1, %s3458_s8  ;;  %p55_p1 = scmp.ne.s32.totalorder %s3458_s8, %s3454_s30 }
  0x19   : > { %p56_p2 = scmp.eq.s32.totalorder %s3478_s13, 0  ;;  %s4435_s16 = smov (%p37_p0, %s36_s16), 0 }
  0x1a   : > { %4372 = sst [smem:[#allocation19_spill]] %s4435_s16  ;;  %s4437_s17 = smov (!%p37_p0, %s39_s17), %s3474_s12 }
  0x1b   : > { %s44_s19 = ssub.s32 %s3470_s11, %s4435_s16  ;;  %p3614_p3 = por %p56_p2, %p55_p1 }
  0x1c   : > { %p41_p4 = scmp.ge.s32.totalorder %s4437_s17, 2  ;;  %p72_p5 = scmp.eq.s32.totalorder %s44_s19, 0 }
  0x1d   : > { %s74_s21 = sadd.s32 1, %s3450_s29  ;;  %p81_p6 = scmp.ne.s32.totalorder %s3450_s29, %s3446_s28 }
  0x1e   : > { %s4439_s17 = smov (%p41_p4, %s4437_s17), 0  ;;  %p87_p8 = scmp.ne.s32.totalorder %s3446_s28, %s3442_s27 }
  0x1f   : > { %4374 = sst [smem:[#allocation20_spill]] %s4439_s17  ;;  %s43_s23 = ssub.s32 %s3474_s12, %s4439_s17 }
  0x20   : > { %s3624_s22 = scalar_select %p72_p5, %s3450_s29, %s74_s21  }
  0x21   : > { %p3630_p7 = por %p81_p6, %p56_p2  ;;  %s45_s16 = sor.u32 %s44_s19, %s43_s23 }
  0x22   : > { %4375 = sst [smem:[#allocation21_spill]] %s3624_s22  ;;  %p46_p9 = scmp.eq.s32.totalorder %s45_s16, 0 }
  0x23   : > { %s4376_s15 = scalar_select %p3630_p7, 1, 0 }
  0x24   : > { %p4348_p10 = scmp.eq.s32.totalorder %s3598_s14, 0  ;;  %p98_p11 = scmp.eq.s32.totalorder %s43_s23, 0 }
  0x25   : > { %s100_s6 = sadd.s32 1, %s3438_s26  ;;  %p107_p13 = scmp.ne.s32.totalorder %s3438_s26, %s3434_s25 }
  0x26   : > { %s3639_s5 = scalar_select %p46_p9, %s3458_s8, %s48_s18  }
  0x27   : > { %p3643_p12 = por %p4348_p10, %p87_p8  ;;  %p3654_p0 = por %p107_p13, %p56_p2 }
  0x28   : > { %4377 = sst [smem:[#allocation22_spill]] %s3639_s5  ;;  %p113_p1 = scmp.ne.s32.totalorder %s3434_s25, %s3430_s24 }
  0x29   : > { %s4378_s21 = scalar_select %p3643_p12, 1, 0 }
  0x2a   : > { %s3650_s17 = scalar_select %p98_p11, %s3438_s26, %s100_s6  }
  0x2b   : > { %s4380_s19 = scalar_select %p3654_p0, 1, 0 }
  0x2c   : > { %4379 = sst [smem:[#allocation23_spill]] %s3650_s17  ;;  %p205_p4 = scmp.eq.s32.totalorder %s3598_s14, 3 }
  0x2d   : > { %s4381_s27 = sadd.s32 4294967294, %s3478_s13   ;;  %p3665_p6 = por %p113_p1, %p4348_p10 }
  0x2e   : > { %p211_p5 = scmp.eq.s32.totalorder %s4381_s27, 3  ;;  %p2493_p8 = scmp.ge.s32.totalorder %s3478_s13, 1 }
  0x2f   : > { %s4382_s16 = scalar_select %p3665_p6, 1, 0 }
  0x30   : > { %p3670_p9 = por %p205_p4, %p107_p13  ;;  %p3674_p11 = por %p211_p5, %p113_p1 }
  0x31   : > { %4383 = sst [smem:[#allocation24_spill]] %s4382_s16  ;;  %p244_p2 = scmp.lt.s32.totalorder %s3478_s13, 5 }
  0x32   : > { %s4384_s18 = scalar_select %p3670_p9, 1, 0 }
  0x33   : > { %s4386_s6 = scalar_select %p3674_p11, 1, 0 }
  0x34   : > { %4385 = sst [smem:[#allocation25_spill]] %s4384_s18  ;;  %p3679_p12 = pnand %p2493_p8, %p244_p2 }
  0x35   : > { %4387 = sst [smem:[#allocation26_spill]] %s4386_s6  ;;  %s3480_s27 = smov [#allocation9]  }
  0x36   : > { %s256_s5 = sshll.u32 %s3480_s27, 4  ;;  %p3018_p10 = pneg %p3679_p12  ;;  %s257_s5 = int_to_ptr.vmem [resolvable:$true] %s256_s5 }
  0x37   : > { %p4389_p6 = scmp.eq.s32.totalorder %s3598_s14, 0  ;;  %s3267_s22 = scalar_lea.vmem %s257_s5, 2048 }
  0x38   : > { %p3268_p9 = scmp.ne.s32.totalorder %s257_s5, %s3267_s22  ;;  %p3275_p0 = scmp.lt.s32.totalorder %s257_s5, %s257_s5 }
  0x39   : > { %p3019_p13 = pnand %p3018_p10, %p4389_p6  ;;  %p3276_p11 = scmp.lt.s32.totalorder %s3267_s22, %s3267_s22 }
  0x3b   : > { %p3258_p4 = pneg %p3019_p13  ;;  %p3277_p7 = por %p3276_p11, %p3275_p0 }
  0x3d   : > { %p3270_p1 = pnand %p3268_p9, %p3258_p4 }
  0x3f   : > { %p3271_p5 = pneg %p3270_p1 }
  0x41   : > { %p3278_p8 = pnand %p3277_p7, %p3271_p5 }
  0x43   : > { %3281 = shalt.err (!%p3278_p8)
}
  0x44   : > { %s3481_s17 = smov 64   ;;  %s3482_s6 = smov 4  }
  0x45   : > { %s4390_s4 = sld [smem:[#allocation30_spill]]  ;;  %p2495_p2 = scmp.ge.s32.totalorder %s3478_s13, 4 }
  0x47   : > { %269 = sbr.rel (%p2495_p2) target bundleno = 127 (0x7f), region = 24 }
  0x4b   : > { %3021 = dma.hbm_to_vmem [thread:$0]  (!%p3019_p13), %s4390_s4, 2048, %s257_s5, [#allocation8], %s3481_s17, %s3481_s17, %s3482_s6  }
  0x4c   : > { %272 = sbr.rel (!%p3614_p3) target bundleno = 94 (0x5e), region = 28  ;;  %s274_s27 = sand.u32 (%p3614_p3), 1, %s3458_s8  }
  0x4d   : > { %s2498_s22 = sshll.u32 (%p3614_p3), %s3470_s11, 1  ;;  %s2496_s9 = sshll.u32 (%p3614_p3), %s274_s27, 7 }
  0x4e   : > { %s2605_s7 = sshll.u32 (%p3614_p3), %s3474_s12, 5  ;;  %s4391_s0 = sld [smem:[#allocation27_spill]] (%p3614_p3) }
  0x4f   : > { %s280_s3 = sadd.s32 (%p3614_p3), %s2605_s7, %s2498_s22  ;;  %s276_s5 = scalar_lea.vmem (%p3614_p3), [#allocation3], %s2496_s9 }
  0x50   : > { %s2500_s10 = sshll.u32 (%p3614_p3), %s280_s3, 3 }
  0x54   : > { %s3699_s24 = scalar_lea.vmem %s4391_s0, %s2500_s10 }
  0x55   : > { %v295_v0 = vld [vmem:[%s3699_s24] sm:$0xff]  ;;  %v297_v1 = vld [vmem:[%s3699_s24 + $0x8] sm:$0xff] }
  0x56   : > { %v299_v2 = vld [vmem:[%s3699_s24 + $0x20] sm:$0xff]  ;;  %296 = vst [vmem:[%s276_s5] sm:$0xff] %v295_v0  ;;  %298 = vst [vmem:[%s276_s5 + $0x8] sm:$0xff] %v297_v1  ;;  %v301_v3 = vld [vmem:[%s3699_s24 + $0x28] sm:$0xff] }
  0x57   : > { %300 = vst [vmem:[%s276_s5 + $0x10] sm:$0xff] %v299_v2  ;;  %v303_v4 = vld [vmem:[%s3699_s24 + $0x40] sm:$0xff]  ;;  %v305_v5 = vld [vmem:[%s3699_s24 + $0x48] sm:$0xff]  ;;  %302 = vst [vmem:[%s276_s5 + $0x18] sm:$0xff] %v301_v3 }
  0x58   : > { %304 = vst [vmem:[%s276_s5 + $0x20] sm:$0xff] %v303_v4  ;;  %306 = vst [vmem:[%s276_s5 + $0x28] sm:$0xff] %v305_v5  ;;  %v307_v6 = vld [vmem:[%s3699_s24 + $0x60] sm:$0xff]  ;;  %v309_v7 = vld [vmem:[%s3699_s24 + $0x68] sm:$0xff] }
  0x59   : > { %v311_v8 = vld [vmem:[%s3699_s24 + $0x80] sm:$0xff]  ;;  %308 = vst [vmem:[%s276_s5 + $0x30] sm:$0xff] %v307_v6  ;;  %310 = vst [vmem:[%s276_s5 + $0x38] sm:$0xff] %v309_v7  ;;  %v313_v9 = vld [vmem:[%s3699_s24 + $0x88] sm:$0xff] }
  0x5a   : > { %312 = vst [vmem:[%s276_s5 + $0x40] sm:$0xff] %v311_v8  ;;  %v315_v10 = vld [vmem:[%s3699_s24 + $0xa0] sm:$0xff]  ;;  %v317_v11 = vld [vmem:[%s3699_s24 + $0xa8] sm:$0xff]  ;;  %314 = vst [vmem:[%s276_s5 + $0x48] sm:$0xff] %v313_v9 }
  0x5b   : > { %316 = vst [vmem:[%s276_s5 + $0x50] sm:$0xff] %v315_v10  ;;  %318 = vst [vmem:[%s276_s5 + $0x58] sm:$0xff] %v317_v11  ;;  %v319_v12 = vld [vmem:[%s3699_s24 + $0xc0] sm:$0xff]  ;;  %v321_v13 = vld [vmem:[%s3699_s24 + $0xc8] sm:$0xff] }
  0x5c   : > { %v323_v14 = vld [vmem:[%s3699_s24 + $0xe0] sm:$0xff]  ;;  %320 = vst [vmem:[%s276_s5 + $0x60] sm:$0xff] %v319_v12  ;;  %322 = vst [vmem:[%s276_s5 + $0x68] sm:$0xff] %v321_v13  ;;  %v325_v15 = vld [vmem:[%s3699_s24 + $0xe8] sm:$0xff] }
  0x5d   : > { %324 = vst [vmem:[%s276_s5 + $0x70] sm:$0xff] %v323_v14  ;;  %326 = vst [vmem:[%s276_s5 + $0x78] sm:$0xff] %v325_v15 }
  0x5e PF: > { %s333_s3 = sand.u32 1, %s3450_s29   ;;  %s2606_s7 = sshll.u32 %s3470_s11, 11 }
  0x5f   : > { %s2501_s25 = sshll.u32 %s333_s3, 7  ;;  %s4392_s1 = sld [smem:[#allocation28_spill]] }
  0x60   : > { %s337_s20 = scalar_lea.vmem [#allocation4], %s2501_s25  ;;  %s334_s18 = scalar_lea.sflag [#allocation5], %s333_s3 }
  0x61   : > { %s344_s16 = sshll.u32 %s337_s20, 4  ;;  %p4393_p7 = scmp.ne.s32.totalorder %s4376_s15, 0  ;;  %s345_s16 = int_to_ptr.vmem [resolvable:$true] %s344_s16 }
  0x62   : > { %s3294_s6 = scalar_lea.vmem %s345_s16, 2048  ;;  %s3483_s27 = smov [#allocation4]  }
  0x63   : > { %p3295_p3 = scmp.ne.s32.totalorder %s345_s16, %s3294_s6  ;;  %s3298_s22 = sshll.u32 %s3483_s27, 4  ;;  %s3299_s22 = int_to_ptr.vmem [resolvable:$false] %s3298_s22 }
  0x64   : > { %s3300_s24 = scalar_lea.vmem %s3299_s22, 4096  ;;  %p3301_p6 = scmp.lt.s32.totalorder %s345_s16, %s3299_s22 }
  0x65   : > { %s343_s17 = scalar_lea.hbm %s4392_s1, %s2606_s7  ;;  %p3296_p10 = pnand %p3295_p3, %p4393_p7 }
  0x66   : > { %p3302_p9 = scmp.lt.s32.totalorder %s3300_s24, %s3294_s6 }
  0x67   : > { %p3297_p0 = pneg %p3296_p10 }
  0x68   : > { %p3303_p11 = por %p3302_p9, %p3301_p6 }
  0x6a   : > { %p3304_p13 = pnand %p3303_p11, %p3297_p0 }
  0x6c   : > { %3307 = shalt.err (!%p3304_p13)
}
  0x6d   : > { %s3484_s5 = smov 64   ;;  %s3485_s3 = smov 4  }
  0x6e   : > { %3010 = dma.hbm_to_vmem [thread:$0]  (%p4393_p7), %s343_s17, 2048, %s345_s16, %s334_s18, %s3484_s5, %s3484_s5, %s3485_s3  }
  0x6f   : > { %s354_s7 = sand.u32 1, %s3478_s13   ;;  %s356_s25 = sand.u32 1, %s3438_s26  }
  0x70   : > { %s2504_s9 = sshll.u32 %s356_s25, 7  ;;  %s2607_s10 = sshll.u32 %s3474_s12, 11 }
  0x71   : > { %s364_s6 = scalar_lea.hbm %s4338_s2, %s2607_s10  ;;  %s358_s22 = scalar_lea.vmem [#allocation7], %s2504_s9 }
  0x72   : > { %s365_s24 = sshll.u32 %s358_s22, 4  ;;  %s355_s0 = scalar_lea.sflag [#allocation8], %s354_s7  ;;  %s366_s24 = int_to_ptr.vmem [resolvable:$true] %s365_s24 }
  0x73   : > { %s3320_s1 = scalar_lea.vmem %s366_s24, 2048  ;;  %p4394_p1 = scmp.ne.s32.totalorder %s4380_s19, 0 }
  0x74   : > { %p3321_p4 = scmp.ne.s32.totalorder %s366_s24, %s3320_s1  ;;  %s3486_s4 = smov [#allocation7]  }
  0x75   : > { %s3324_s15 = sshll.u32 %s3486_s4, 4  ;;  %s3325_s15 = int_to_ptr.vmem [resolvable:$false] %s3324_s15 }
  0x76   : > { %p3322_p5 = pnand %p3321_p4, %p4394_p1  ;;  %s3326_s17 = scalar_lea.vmem %s3325_s15, 4096 }
  0x77   : > { %p3327_p2 = scmp.lt.s32.totalorder %s366_s24, %s3325_s15  ;;  %p3328_p3 = scmp.lt.s32.totalorder %s3326_s17, %s3320_s1 }
  0x78   : > { %p3323_p8 = pneg %p3322_p5 }
  0x79   : > { %p3329_p7 = por %p3328_p3, %p3327_p2 }
  0x7b   : > { %p3330_p10 = pnand %p3329_p7, %p3323_p8 }
  0x7d   : > { %3333 = shalt.err (!%p3330_p10)
}
  0x7e   : > { %3011 = dma.hbm_to_vmem [thread:$0]  (%p4394_p1), %s364_s6, 2048, %s366_s24, %s355_s0, %s3484_s5, %s3484_s5, %s3485_s3  }
  0x7f PF: > { %386 = sbr.rel (%p3679_p12) target bundleno = 938 (0x3aa), region = 63  ;;  %s389_s16 = sand.u32 (!%p3679_p12), 1, %s3454_s30  }
  0x80   : > { %s395_s18 = sand.u32 (!%p3679_p12), 1, %s3446_s28   ;;  %s2508_s4 = sshll.u32 (!%p3679_p12), %s389_s16, 7 }
  0x81   : > { %s2509_s7 = sshll.u32 (!%p3679_p12), %s395_s18, 7  ;;  %s3740_s25 = scalar_lea.vmem (!%p3679_p12), [#allocation3], %s2508_s4 }
  0x82   : > { %s396_s1 = scalar_lea.sflag (!%p3679_p12), [#allocation5], %s395_s18  ;;  %s3742_s9 = scalar_lea.vmem (!%p3679_p12), [#allocation4], %s2509_s7 }
  0x83   : > { %p4395_p0 = scmp.ne.s32.totalorder (!%p3679_p12), %s4378_s21, 0 }
  0x85   : > { %3413 = dma.done.wait (%p4395_p0), %s396_s1, 2048  }
  0x86   : > { %3415 = vsyncadd (%p4395_p0), %s396_s1, 4294965248  ;;  %s4396_s0 = sld [smem:[#allocation16_spill]]  ;;  %s404_s23 = sand.u32 1, %s3598_s14  }
  0x87   : > { %s4397_s19 = sld [smem:[#allocation24_spill]]  ;;  %s405_s3 = scalar_lea.sflag [#allocation8], %s404_s23 }
  0x8c   : > { %s406_s5 = sand.u32 1, %s4396_s0  }
  0x8d   : > { %s2510_s30 = sshll.u32 %s406_s5, 7  ;;  %p4398_p12 = scmp.ne.s32.totalorder %s4397_s19, 0 }
  0x8e   : > { %s3752_s10 = scalar_lea.vmem [#allocation7], %s2510_s30 }
  0x8f   : > { %3417 = dma.done.wait (%p4398_p12), %s405_s3, 2048  }
  0x90   : > { %3419 = vsyncadd (%p4398_p12), %s405_s3, 4294965248  ;;  %p4399_p6 = scmp.eq.s32.totalorder %s3598_s14, 0 }
  0x92   : > { %3421 = dma.done.wait (%p4399_p6), [#allocation8], 2048   ;;  %p4400_p9 = pmov %p4399_p6 }
  0x93   : > { %s4401_s21 = sld [smem:[#allocation18_spill]]  ;;  %s3773_s7 = scalar_lea.vmem [#allocation10], %s2510_s30 }
  0x94   : > { %3423 = vsyncadd (%p4400_p9), [#allocation8], 4294965248  ;;  %s4402_s24 = sld [smem:[#allocation29_spill]] }
  0x95   : > { %s4403_s18 = sld [smem:[#allocation33_spill]] }
  0x96   : > { %s4404_s1 = sld [smem:[#allocation17_spill]] }
  0x99   : > { %s2513_s20 = sshll.u32 %s4401_s21, 5 }
  0x9a   : > { %p467_p11 = scmp.lt.s32.totalorder %s2513_s20, 63 }
  0x9c   : > { %s4441_s20 = smov (!%p467_p11, %s2513_s20), 63  ;;  %p2517_p13 = scmp.ne.s32.totalorder %s4404_s1, 0 }
  0x9d   : > { %s2514_s27 = sshll.u32 %s4441_s20, 3 }
  0x9e   : > { %s3766_s15 = scalar_lea.vmem %s4402_s24, %s2514_s27  ;;  %s3771_s4 = scalar_lea.vmem %s4403_s18, %s2514_s27 }
  0x9f   : > { %483 = sbr.rel (%p2517_p13) target bundleno = 181 (0xb5), region = 83 }
  0xa4   : > { %v3487_v16 = vmov 0.0  }
  0xa5   : > { %484 = vst [vmem:[#allocation2 + $0xb0] sm:$0xff] %v3487_v16  ;;  %485 = vst [vmem:[#allocation2] sm:$0xff] %v3487_v16 }
  0xa6   : > { %486 = vst [vmem:[#allocation2 + $0xd8] sm:$0xff] %v3487_v16  ;;  %487 = vst [vmem:[#allocation2 + $0x18] sm:$0xff] %v3487_v16 }
  0xa7   : > { %488 = vst [vmem:[#allocation2 + $0x50] sm:$0xff] %v3487_v16  ;;  %489 = vst [vmem:[#allocation2 + $0x68] sm:$0xff] %v3487_v16 }
  0xa8   : > { %490 = vst [vmem:[#allocation2 + $0x30] sm:$0xff] %v3487_v16  ;;  %491 = vst [vmem:[#allocation2 + $0x48] sm:$0xff] %v3487_v16 }
  0xa9   : > { %492 = vst [vmem:[#allocation2 + $0x80] sm:$0xff] %v3487_v16  ;;  %493 = vst [vmem:[#allocation2 + $0x88] sm:$0xff] %v3487_v16 }
  0xaa   : > { %494 = vst [vmem:[#allocation2 + $0xe8] sm:$0xff] %v3487_v16  ;;  %495 = vst [vmem:[#allocation2 + $0xb8] sm:$0xff] %v3487_v16 }
  0xab   : > { %496 = vst [vmem:[#allocation2 + $0x60] sm:$0xff] %v3487_v16  ;;  %497 = vst [vmem:[#allocation2 + $0xf0] sm:$0xff] %v3487_v16 }
  0xac   : > { %498 = vst [vmem:[#allocation2 + $0x8] sm:$0xff] %v3487_v16  ;;  %499 = vst [vmem:[#allocation2 + $0x78] sm:$0xff] %v3487_v16 }
  0xad   : > { %500 = vst [vmem:[#allocation2 + $0x38] sm:$0xff] %v3487_v16  ;;  %501 = vst [vmem:[#allocation2 + $0x58] sm:$0xff] %v3487_v16 }
  0xae   : > { %502 = vst [vmem:[#allocation2 + $0x40] sm:$0xff] %v3487_v16  ;;  %503 = vst [vmem:[#allocation2 + $0xc8] sm:$0xff] %v3487_v16 }
  0xaf   : > { %504 = vst [vmem:[#allocation2 + $0xe0] sm:$0xff] %v3487_v16  ;;  %505 = vst [vmem:[#allocation2 + $0x90] sm:$0xff] %v3487_v16 }
  0xb0   : > { %506 = vst [vmem:[#allocation2 + $0x70] sm:$0xff] %v3487_v16  ;;  %507 = vst [vmem:[#allocation2 + $0xc0] sm:$0xff] %v3487_v16 }
  0xb1   : > { %508 = vst [vmem:[#allocation2 + $0xa8] sm:$0xff] %v3487_v16  ;;  %509 = vst [vmem:[#allocation2 + $0xd0] sm:$0xff] %v3487_v16 }
  0xb2   : > { %510 = vst [vmem:[#allocation2 + $0x10] sm:$0xff] %v3487_v16  ;;  %511 = vst [vmem:[#allocation2 + $0x28] sm:$0xff] %v3487_v16 }
  0xb3   : > { %512 = vst [vmem:[#allocation2 + $0xa0] sm:$0xff] %v3487_v16  ;;  %513 = vst [vmem:[#allocation2 + $0xf8] sm:$0xff] %v3487_v16 }
  0xb4   : > { %514 = vst [vmem:[#allocation2 + $0x20] sm:$0xff] %v3487_v16  ;;  %515 = vst [vmem:[#allocation2 + $0x98] sm:$0xff] %v3487_v16 }
  0xb5 PF: > { %v3142_v17 = vld [vmem:[%s3742_s9 + $0x78] sm:$0xff]   ;;  %v3144_v19 = vld [vmem:[%s3742_s9 + $0x70] sm:$0xff]   ;;  %v3146_v21 = vld [vmem:[%s3742_s9 + $0x68] sm:$0xff]   ;;  %s4405_s14 = sld [smem:[#allocation17_spill]] }
  0xb6   : > { %v3143_v18 = vld [vmem:[%s3742_s9 + $0x38] sm:$0xff]   ;;  %2736 = vmatprep.subr.bf16.mxu0 %v3142_v17  ;;  %2992 = vmatprep.subr.bf16.mxu1 %v3142_v17  ;;  %v3145_v20 = vld [vmem:[%s3742_s9 + $0x30] sm:$0xff]   ;;  %v3147_v22 = vld [vmem:[%s3742_s9 + $0x28] sm:$0xff]  }
  0xb7   : > { %2737 = vmatpush3.bf16.msra.mxu0 %v3143_v18  ;;  %3000 = vmatpush3.bf16.msra.mxu1 %v3143_v18  ;;  %v3148_v23 = vld [vmem:[%s3742_s9 + $0x60] sm:$0xff]   ;;  %v3150_v25 = vld [vmem:[%s3742_s9 + $0x58] sm:$0xff]   ;;  %v3152_v27 = vld [vmem:[%s3742_s9 + $0x50] sm:$0xff]  }
  0xb8   : > { %2738 = vmatprep.subr.bf16.mxu0 %v3144_v19  ;;  %2993 = vmatprep.subr.bf16.mxu1 %v3144_v19  ;;  %v3149_v24 = vld [vmem:[%s3742_s9 + $0x20] sm:$0xff]   ;;  %v3151_v26 = vld [vmem:[%s3742_s9 + $0x18] sm:$0xff]   ;;  %v517_v28 = vld [vmem:[%s3740_s25 + $0x8] sm:$0xff] }
  0xb9   : > { %v525_v29 = vld [vmem:[%s3740_s25 + $0x48] sm:$0xff]  ;;  %v533_v30 = vunpack.c.l.s8.bf16 %v517_v28  ;;  %v3153_v32 = vld [vmem:[%s3742_s9 + $0x10] sm:$0xff]   ;;  %v3156_v35 = vld [vmem:[%s3742_s9 + $0x40] sm:$0xff]   ;;  %v535_v41 = vunpack.c.h.s8.bf16 %v517_v28 }
  0xba   : > { %v549_v31 = vunpack.c.l.s8.bf16 %v525_v29  ;;  %v3154_v33 = vld [vmem:[%s3742_s9 + $0x48] sm:$0xff]   ;;  %v3157_v36 = vld [vmem:[%s3742_s9] sm:$0xff]   ;;  %v551_v42 = vunpack.c.h.s8.bf16 %v525_v29  ;;  %v519_v43 = vld [vmem:[%s3740_s25 + $0x18] sm:$0xff] }
  0xbb   : > { %2739 = vmatpush3.bf16.msra.mxu0 %v3145_v20  ;;  %3001 = vmatpush3.bf16.msra.mxu1 %v3145_v20  ;;  %v3155_v34 = vld [vmem:[%s3742_s9 + $0x8] sm:$0xff]   ;;  %v516_v37 = vld [vmem:[%s3740_s25] sm:$0xff]  ;;  %v527_v44 = vld [vmem:[%s3740_s25 + $0x58] sm:$0xff]  ;;  %v537_v47 = vunpack.c.l.s8.bf16 %v519_v43  ;;  %v539_v53 = vunpack.c.h.s8.bf16 %v519_v43  ;;  %p2534_p4 = scmp.ne.s32.totalorder %s4405_s14, 1 }
  0xbc   : > { %2740 = vmatprep.subr.bf16.mxu0 %v3146_v21  ;;  %2994 = vmatprep.subr.bf16.mxu1 %v3146_v21  ;;  %v524_v38 = vld [vmem:[%s3740_s25 + $0x40] sm:$0xff]  ;;  %v532_v39 = vunpack.c.l.s8.bf16 %v516_v37  ;;  %v534_v45 = vunpack.c.h.s8.bf16 %v516_v37  ;;  %v553_v48 = vunpack.c.l.s8.bf16 %v527_v44  ;;  %v518_v49 = vld [vmem:[%s3740_s25 + $0x10] sm:$0xff]  ;;  %v555_v54 = vunpack.c.h.s8.bf16 %v527_v44  ;;  %v521_v55 = vld [vmem:[%s3740_s25 + $0x28] sm:$0xff]  ;;  %s4406_s0 = sld [smem:[#allocation31_spill]] (!%p2534_p4) }
  0xbd   : > { %756 = vmatprep.mubr.bf16.mxu0 %v533_v30  ;;  %820 = vmatprep.mubr.bf16.mxu1 %v549_v31  ;;  %v548_v40 = vunpack.c.l.s8.bf16 %v524_v38  ;;  %v550_v46 = vunpack.c.h.s8.bf16 %v524_v38  ;;  %v526_v50 = vld [vmem:[%s3740_s25 + $0x50] sm:$0xff]  ;;  %v536_v51 = vunpack.c.l.s8.bf16 %v518_v49  ;;  %v529_v56 = vld [vmem:[%s3740_s25 + $0x68] sm:$0xff]  ;;  %v538_v57 = vunpack.c.h.s8.bf16 %v518_v49  ;;  %v520_v61 = vld [vmem:[%s3740_s25 + $0x20] sm:$0xff] }
  0xbe   : > { %v552_v52 = vunpack.c.l.s8.bf16 %v526_v50  ;;  %v554_v58 = vunpack.c.h.s8.bf16 %v526_v50  ;;  %v541_v59 = vunpack.c.l.s8.bf16 %v521_v55  ;;  %v557_v60 = vunpack.c.l.s8.bf16 %v529_v56  ;;  %v528_v62 = vld [vmem:[%s3740_s25 + $0x60] sm:$0xff]  ;;  %v523_v3 = vld [vmem:[%s3740_s25 + $0x38] sm:$0xff]  ;;  %v522_v9 = vld [vmem:[%s3740_s25 + $0x30] sm:$0xff] }
  0xbf   : > { %2741 = vmatpush3.bf16.msra.mxu0 %v3147_v22  ;;  %3002 = vmatpush3.bf16.msra.mxu1 %v3147_v22  ;;  %v540_v63 = vunpack.c.l.s8.bf16 %v520_v61  ;;  %v556_v0 = vunpack.c.l.s8.bf16 %v528_v62  ;;  %v543_v1 = vunpack.c.h.s8.bf16 %v521_v55  ;;  %v559_v2 = vunpack.c.h.s8.bf16 %v529_v56  ;;  %v531_v4 = vld [vmem:[%s3740_s25 + $0x78] sm:$0xff]  ;;  %v530_v10 = vld [vmem:[%s3740_s25 + $0x70] sm:$0xff]  ;;  %v565_v29 = vld [vmem:[#allocation2] sm:$0xff] }
  0xc0   : > { %2742 = vmatprep.subr.bf16.mxu0 %v3148_v23  ;;  %2995 = vmatprep.subr.bf16.mxu1 %v3148_v23  ;;  %v542_v5 = vunpack.c.h.s8.bf16 %v520_v61  ;;  %v558_v6 = vunpack.c.h.s8.bf16 %v528_v62  ;;  %v545_v7 = vunpack.c.l.s8.bf16 %v523_v3  ;;  %v561_v8 = vunpack.c.l.s8.bf16 %v531_v4  ;;  %v564_v19 = vld [vmem:[#allocation2 + $0xb0] sm:$0xff]  ;;  %v580_v21 = vld [vmem:[#allocation2 + $0x38] sm:$0xff]  ;;  %v584_v61 = vld [vmem:[#allocation2 + $0xe0] sm:$0xff] }
  0xc1   : > { %v544_v11 = vunpack.c.l.s8.bf16 %v522_v9  ;;  %v560_v12 = vunpack.c.l.s8.bf16 %v530_v10  ;;  %v547_v13 = vunpack.c.h.s8.bf16 %v523_v3  ;;  %v563_v14 = vunpack.c.h.s8.bf16 %v531_v4  ;;  %v581_v31 = vld [vmem:[#allocation2 + $0x58] sm:$0xff] }
  0xc2   : > { %v546_v15 = vunpack.c.h.s8.bf16 %v522_v9  ;;  %v562_v16 = vunpack.c.h.s8.bf16 %v530_v10  ;;  %v567_v49 = vld [vmem:[#allocation2 + $0x18] sm:$0xff] }
  0xc3   : > { %2743 = vmatpush3.bf16.msra.mxu0 %v3149_v24  ;;  %3003 = vmatpush3.bf16.msra.mxu1 %v3149_v24 }
  0xc4   : > { %2744 = vmatprep.subr.bf16.mxu0 %v3150_v25  ;;  %2996 = vmatprep.subr.bf16.mxu1 %v3150_v25 }
  0xc7   : > { %2745 = vmatpush3.bf16.msra.mxu0 %v3151_v26  ;;  %3004 = vmatpush3.bf16.msra.mxu1 %v3151_v26 }
  0xc8   : > { %2746 = vmatprep.subr.bf16.mxu0 %v3152_v27  ;;  %2997 = vmatprep.subr.bf16.mxu1 %v3152_v27 }
  0xcb   : > { %2747 = vmatpush3.bf16.msra.mxu0 %v3153_v32  ;;  %3005 = vmatpush3.bf16.msra.mxu1 %v3153_v32 }
  0xcc   : > { %2748 = vmatprep.subr.bf16.mxu0 %v3154_v33  ;;  %2998 = vmatprep.subr.bf16.mxu1 %v3154_v33 }
  0xcf   : > { %2749 = vmatpush3.bf16.msra.mxu0 %v3155_v34  ;;  %3006 = vmatpush3.bf16.msra.mxu1 %v3155_v34 }
  0xd0   : > { %2750 = vmatprep.subr.bf16.mxu0 %v3156_v35  ;;  %2999 = vmatprep.subr.bf16.mxu1 %v3156_v35 }
  0xd3   : > { %2751 = vmatpush3.bf16.msra.mxu0 %v3157_v36  ;;  %3007 = vmatpush3.bf16.msra.mxu1 %v3157_v36 }
  0xd6   : > { %757 = vmatmul.mubr.bf16.vlgmr.msra.gmra.mxu0 %v532_v39  ;;  %821 = vmatmul.mubr.bf16.vlgmr.msra.gmra.mxu1 %v548_v40  ;;  %v566_v39 = vld [vmem:[#allocation2 + $0xd8] sm:$0xff] }
  0xd7   : > { %764 = vmatprep.mubr.bf16.mxu0 %v535_v41  ;;  %828 = vmatprep.mubr.bf16.mxu1 %v551_v42  ;;  %v582_v41 = vld [vmem:[#allocation2 + $0x40] sm:$0xff] }
  0xde   : > { %765 = vmatmul.mubr.bf16.gmra.mxu0 %v534_v45  ;;  %829 = vmatmul.mubr.bf16.gmra.mxu1 %v550_v46 }
  0xdf   : > { %772 = vmatprep.mubr.bf16.mxu0 %v537_v47  ;;  %836 = vmatprep.mubr.bf16.mxu1 %v553_v48 }
  0xe6   : > { %773 = vmatmul.mubr.bf16.gmra.mxu0 %v536_v51  ;;  %837 = vmatmul.mubr.bf16.gmra.mxu1 %v552_v52  ;;  %v583_v51 = vld [vmem:[#allocation2 + $0xc8] sm:$0xff] }
  0xe7   : > { %780 = vmatprep.mubr.bf16.mxu0 %v539_v53  ;;  %844 = vmatprep.mubr.bf16.mxu1 %v555_v54 }
  0xee   : > { %781 = vmatmul.mubr.bf16.gmra.mxu0 %v538_v57  ;;  %845 = vmatmul.mubr.bf16.gmra.mxu1 %v554_v58 }
  0xef   : > { %788 = vmatprep.mubr.bf16.mxu0 %v541_v59  ;;  %852 = vmatprep.mubr.bf16.mxu1 %v557_v60  ;;  %v568_v59 = vld [vmem:[#allocation2 + $0x50] sm:$0xff] }
  0xf6   : > { %789 = vmatmul.mubr.bf16.gmra.mxu0 %v540_v63  ;;  %853 = vmatmul.mubr.bf16.gmra.mxu1 %v556_v0 }
  0xf7   : > { %796 = vmatprep.mubr.bf16.mxu0 %v543_v1  ;;  %860 = vmatprep.mubr.bf16.mxu1 %v559_v2 }
  0xfe   : > { %797 = vmatmul.mubr.bf16.gmra.mxu0 %v542_v5  ;;  %861 = vmatmul.mubr.bf16.gmra.mxu1 %v558_v6  ;;  %v569_v5 = vld [vmem:[#allocation2 + $0x68] sm:$0xff] }
  0xff   : > { %804 = vmatprep.mubr.bf16.mxu0 %v545_v7  ;;  %868 = vmatprep.mubr.bf16.mxu1 %v561_v8  ;;  %v585_v7 = vld [vmem:[#allocation2 + $0x90] sm:$0xff] }
 0x106   : > { %805 = vmatmul.mubr.bf16.gmra.mxu0 %v544_v11  ;;  %869 = vmatmul.mubr.bf16.gmra.mxu1 %v560_v12 }
 0x107   : > { %812 = vmatprep.mubr.bf16.mxu0 %v547_v13  ;;  %876 = vmatprep.mubr.bf16.mxu1 %v563_v14 }
 0x10e   : > { %813 = vmatmul.mubr.bf16.gmra.mxu0 %v546_v15  ;;  %877 = vmatmul.mubr.bf16.gmra.mxu1 %v562_v16  ;;  %v570_v15 = vld [vmem:[#allocation2 + $0x30] sm:$0xff] }
 0x196   : > { %v2752_v17 = vpop.f32.mrf.mxu0  ;;  %v2800_v18 = vpop.f32.mrf.mxu1 }
 0x198   : > { %v2753_v20 = vpop.f32.mrf.mxu0  ;;  %v2801_v22 = vpop.f32.mrf.mxu1 }
 0x199   : > { %v2754_v23 = vadd.f32 %v2753_v20, %v2752_v17  ;;  %v2802_v24 = vadd.f32 %v2801_v22, %v2800_v18  ;;  %v586_v17 = vld [vmem:[#allocation2 + $0x70] sm:$0xff] }
 0x19a   : > { %v2755_v25 = vpop.f32.mrf.mxu0  ;;  %v2803_v26 = vpop.f32.mrf.mxu1 }
 0x19b   : > { %v885_v27 = vadd.f32 %v2754_v23, %v564_v19  ;;  %v901_v28 = vadd.f32 %v2802_v24, %v580_v21 }
 0x19c   : > { %v2756_v30 = vpop.f32.mrf.mxu0  ;;  %v2804_v32 = vpop.f32.mrf.mxu1 }
 0x19d   : > { %917 = vst [vmem:[#allocation2 + $0xb0] sm:$0xff] %v885_v27  ;;  %933 = vst [vmem:[#allocation2 + $0x38] sm:$0xff] %v901_v28  ;;  %v2757_v33 = vadd.f32 %v2756_v30, %v2755_v25  ;;  %v2805_v34 = vadd.f32 %v2804_v32, %v2803_v26  ;;  %v571_v25 = vld [vmem:[#allocation2 + $0x48] sm:$0xff]  ;;  %v587_v27 = vld [vmem:[#allocation2 + $0xc0] sm:$0xff] }
 0x19e   : > { %v2758_v35 = vpop.f32.mrf.mxu0  ;;  %v2806_v36 = vpop.f32.mrf.mxu1 }
 0x19f   : > { %v886_v37 = vadd.f32 %v2757_v33, %v565_v29  ;;  %v902_v38 = vadd.f32 %v2805_v34, %v581_v31 }
 0x1a0   : > { %v2759_v40 = vpop.f32.mrf.mxu0  ;;  %v2807_v42 = vpop.f32.mrf.mxu1 }
 0x1a1   : > { %918 = vst [vmem:[#allocation2] sm:$0xff] %v886_v37  ;;  %934 = vst [vmem:[#allocation2 + $0x58] sm:$0xff] %v902_v38  ;;  %v2760_v43 = vadd.f32 %v2759_v40, %v2758_v35  ;;  %v2808_v44 = vadd.f32 %v2807_v42, %v2806_v36  ;;  %v572_v35 = vld [vmem:[#allocation2 + $0x80] sm:$0xff]  ;;  %v588_v37 = vld [vmem:[#allocation2 + $0xa8] sm:$0xff] }
 0x1a2   : > { %v2761_v45 = vpop.f32.mrf.mxu0  ;;  %v2809_v46 = vpop.f32.mrf.mxu1 }
 0x1a3   : > { %v887_v47 = vadd.f32 %v2760_v43, %v566_v39  ;;  %v903_v48 = vadd.f32 %v2808_v44, %v582_v41 }
 0x1a4   : > { %v2762_v50 = vpop.f32.mrf.mxu0  ;;  %v2810_v52 = vpop.f32.mrf.mxu1 }
 0x1a5   : > { %919 = vst [vmem:[#allocation2 + $0xd8] sm:$0xff] %v887_v47  ;;  %935 = vst [vmem:[#allocation2 + $0x40] sm:$0xff] %v903_v48  ;;  %v2763_v53 = vadd.f32 %v2762_v50, %v2761_v45  ;;  %v2811_v54 = vadd.f32 %v2810_v52, %v2809_v46  ;;  %v573_v45 = vld [vmem:[#allocation2 + $0x88] sm:$0xff]  ;;  %v589_v47 = vld [vmem:[#allocation2 + $0xd0] sm:$0xff] }
 0x1a6   : > { %v2764_v55 = vpop.f32.mrf.mxu0  ;;  %v2812_v56 = vpop.f32.mrf.mxu1 }
 0x1a7   : > { %v888_v57 = vadd.f32 %v2763_v53, %v567_v49  ;;  %v904_v58 = vadd.f32 %v2811_v54, %v583_v51 }
 0x1a8   : > { %v2765_v60 = vpop.f32.mrf.mxu0  ;;  %v2813_v62 = vpop.f32.mrf.mxu1 }
 0x1a9   : > { %920 = vst [vmem:[#allocation2 + $0x18] sm:$0xff] %v888_v57  ;;  %936 = vst [vmem:[#allocation2 + $0xc8] sm:$0xff] %v904_v58  ;;  %v2766_v63 = vadd.f32 %v2765_v60, %v2764_v55  ;;  %v2814_v0 = vadd.f32 %v2813_v62, %v2812_v56  ;;  %v574_v55 = vld [vmem:[#allocation2 + $0xe8] sm:$0xff]  ;;  %v590_v57 = vld [vmem:[#allocation2 + $0x10] sm:$0xff] }
 0x1aa   : > { %v2767_v1 = vpop.f32.mrf.mxu0  ;;  %v2815_v2 = vpop.f32.mrf.mxu1 }
 0x1ab   : > { %v889_v3 = vadd.f32 %v2766_v63, %v568_v59  ;;  %v905_v4 = vadd.f32 %v2814_v0, %v584_v61 }
 0x1ac   : > { %v2768_v6 = vpop.f32.mrf.mxu0  ;;  %v2816_v8 = vpop.f32.mrf.mxu1 }
 0x1ad   : > { %921 = vst [vmem:[#allocation2 + $0x50] sm:$0xff] %v889_v3  ;;  %937 = vst [vmem:[#allocation2 + $0xe0] sm:$0xff] %v905_v4  ;;  %v2769_v9 = vadd.f32 %v2768_v6, %v2767_v1  ;;  %v2817_v10 = vadd.f32 %v2816_v8, %v2815_v2  ;;  %v575_v1 = vld [vmem:[#allocation2 + $0xb8] sm:$0xff]  ;;  %v591_v3 = vld [vmem:[#allocation2 + $0x28] sm:$0xff] }
 0x1ae   : > { %v2770_v11 = vpop.f32.mrf.mxu0  ;;  %v2818_v12 = vpop.f32.mrf.mxu1 }
 0x1af   : > { %v890_v13 = vadd.f32 %v2769_v9, %v569_v5  ;;  %v906_v14 = vadd.f32 %v2817_v10, %v585_v7 }
 0x1b0   : > { %v2771_v16 = vpop.f32.mrf.mxu0  ;;  %v2819_v18 = vpop.f32.mrf.mxu1 }
 0x1b1   : > { %922 = vst [vmem:[#allocation2 + $0x68] sm:$0xff] %v890_v13  ;;  %938 = vst [vmem:[#allocation2 + $0x90] sm:$0xff] %v906_v14  ;;  %v2772_v19 = vadd.f32 %v2771_v16, %v2770_v11  ;;  %v2820_v20 = vadd.f32 %v2819_v18, %v2818_v12  ;;  %v576_v11 = vld [vmem:[#allocation2 + $0x60] sm:$0xff] }
 0x1b2   : > { %v2773_v21 = vpop.f32.mrf.mxu0  ;;  %v2821_v22 = vpop.f32.mrf.mxu1  ;;  %v592_v13 = vld [vmem:[#allocation2 + $0xa0] sm:$0xff] }
 0x1b3   : > { %v891_v23 = vadd.f32 %v2772_v19, %v570_v15  ;;  %v907_v24 = vadd.f32 %v2820_v20, %v586_v17 }
 0x1b4   : > { %v2774_v26 = vpop.f32.mrf.mxu0  ;;  %v2822_v28 = vpop.f32.mrf.mxu1 }
 0x1b5   : > { %923 = vst [vmem:[#allocation2 + $0x30] sm:$0xff] %v891_v23  ;;  %939 = vst [vmem:[#allocation2 + $0x70] sm:$0xff] %v907_v24  ;;  %v2775_v29 = vadd.f32 %v2774_v26, %v2773_v21  ;;  %v2823_v30 = vadd.f32 %v2822_v28, %v2821_v22  ;;  %v577_v21 = vld [vmem:[#allocation2 + $0xf0] sm:$0xff]  ;;  %v593_v23 = vld [vmem:[#allocation2 + $0xf8] sm:$0xff] }
 0x1b6   : > { %v2776_v31 = vpop.f32.mrf.mxu0  ;;  %v2824_v32 = vpop.f32.mrf.mxu1 }
 0x1b7   : > { %v892_v33 = vadd.f32 %v2775_v29, %v571_v25  ;;  %v908_v34 = vadd.f32 %v2823_v30, %v587_v27 }
 0x1b8   : > { %v2777_v36 = vpop.f32.mrf.mxu0  ;;  %v2825_v38 = vpop.f32.mrf.mxu1 }
 0x1b9   : > { %924 = vst [vmem:[#allocation2 + $0x48] sm:$0xff] %v892_v33  ;;  %940 = vst [vmem:[#allocation2 + $0xc0] sm:$0xff] %v908_v34  ;;  %v2778_v39 = vadd.f32 %v2777_v36, %v2776_v31  ;;  %v2826_v40 = vadd.f32 %v2825_v38, %v2824_v32  ;;  %v578_v31 = vld [vmem:[#allocation2 + $0x8] sm:$0xff]  ;;  %v594_v33 = vld [vmem:[#allocation2 + $0x20] sm:$0xff] }
 0x1ba   : > { %v2779_v41 = vpop.f32.mrf.mxu0  ;;  %v2827_v42 = vpop.f32.mrf.mxu1 }
 0x1bb   : > { %v893_v43 = vadd.f32 %v2778_v39, %v572_v35  ;;  %v909_v44 = vadd.f32 %v2826_v40, %v588_v37 }
 0x1bc   : > { %v2780_v46 = vpop.f32.mrf.mxu0  ;;  %v2828_v48 = vpop.f32.mrf.mxu1 }
 0x1bd   : > { %925 = vst [vmem:[#allocation2 + $0x80] sm:$0xff] %v893_v43  ;;  %941 = vst [vmem:[#allocation2 + $0xa8] sm:$0xff] %v909_v44  ;;  %v2781_v49 = vadd.f32 %v2780_v46, %v2779_v41  ;;  %v2829_v50 = vadd.f32 %v2828_v48, %v2827_v42  ;;  %v579_v41 = vld [vmem:[#allocation2 + $0x78] sm:$0xff] }
 0x1be   : > { %v2782_v51 = vpop.f32.mrf.mxu0  ;;  %v2830_v52 = vpop.f32.mrf.mxu1  ;;  %v595_v43 = vld [vmem:[#allocation2 + $0x98] sm:$0xff] }
 0x1bf   : > { %v894_v53 = vadd.f32 %v2781_v49, %v573_v45  ;;  %v910_v54 = vadd.f32 %v2829_v50, %v589_v47 }
 0x1c0   : > { %v2783_v56 = vpop.f32.mrf.mxu0  ;;  %v2831_v58 = vpop.f32.mrf.mxu1 }
 0x1c1   : > { %926 = vst [vmem:[#allocation2 + $0x88] sm:$0xff] %v894_v53  ;;  %942 = vst [vmem:[#allocation2 + $0xd0] sm:$0xff] %v910_v54  ;;  %v2784_v59 = vadd.f32 %v2783_v56, %v2782_v51  ;;  %v2832_v60 = vadd.f32 %v2831_v58, %v2830_v52 }
 0x1c2   : > { %v2785_v61 = vpop.f32.mrf.mxu0  ;;  %v2833_v62 = vpop.f32.mrf.mxu1 }
 0x1c3   : > { %v895_v63 = vadd.f32 %v2784_v59, %v574_v55  ;;  %v911_v0 = vadd.f32 %v2832_v60, %v590_v57 }
 0x1c4   : > { %v2786_v2 = vpop.f32.mrf.mxu0  ;;  %v2834_v4 = vpop.f32.mrf.mxu1 }
 0x1c5   : > { %927 = vst [vmem:[#allocation2 + $0xe8] sm:$0xff] %v895_v63  ;;  %943 = vst [vmem:[#allocation2 + $0x10] sm:$0xff] %v911_v0  ;;  %v2787_v5 = vadd.f32 %v2786_v2, %v2785_v61  ;;  %v2835_v6 = vadd.f32 %v2834_v4, %v2833_v62 }
 0x1c6   : > { %v2788_v7 = vpop.f32.mrf.mxu0  ;;  %v2836_v8 = vpop.f32.mrf.mxu1 }
 0x1c7   : > { %v896_v9 = vadd.f32 %v2787_v5, %v575_v1  ;;  %v912_v10 = vadd.f32 %v2835_v6, %v591_v3 }
 0x1c8   : > { %v2789_v12 = vpop.f32.mrf.mxu0  ;;  %v2837_v14 = vpop.f32.mrf.mxu1 }
 0x1c9   : > { %928 = vst [vmem:[#allocation2 + $0xb8] sm:$0xff] %v896_v9  ;;  %944 = vst [vmem:[#allocation2 + $0x28] sm:$0xff] %v912_v10  ;;  %v2790_v15 = vadd.f32 %v2789_v12, %v2788_v7  ;;  %v2838_v16 = vadd.f32 %v2837_v14, %v2836_v8 }
 0x1ca   : > { %v2791_v17 = vpop.f32.mrf.mxu0  ;;  %v2839_v18 = vpop.f32.mrf.mxu1 }
 0x1cb   : > { %v897_v19 = vadd.f32 %v2790_v15, %v576_v11  ;;  %v913_v20 = vadd.f32 %v2838_v16, %v592_v13 }
 0x1cc   : > { %v2792_v22 = vpop.f32.mrf.mxu0  ;;  %v2840_v24 = vpop.f32.mrf.mxu1 }
 0x1cd   : > { %929 = vst [vmem:[#allocation2 + $0x60] sm:$0xff] %v897_v19  ;;  %945 = vst [vmem:[#allocation2 + $0xa0] sm:$0xff] %v913_v20  ;;  %v2793_v25 = vadd.f32 %v2792_v22, %v2791_v17  ;;  %v2841_v26 = vadd.f32 %v2840_v24, %v2839_v18 }
 0x1ce   : > { %v2794_v27 = vpop.f32.mrf.mxu0  ;;  %v2842_v28 = vpop.f32.mrf.mxu1 }
 0x1cf   : > { %v898_v29 = vadd.f32 %v2793_v25, %v577_v21  ;;  %v914_v30 = vadd.f32 %v2841_v26, %v593_v23 }
 0x1d0   : > { %v2795_v32 = vpop.f32.mrf.mxu0  ;;  %v2843_v34 = vpop.f32.mrf.mxu1 }
 0x1d1   : > { %930 = vst [vmem:[#allocation2 + $0xf0] sm:$0xff] %v898_v29  ;;  %946 = vst [vmem:[#allocation2 + $0xf8] sm:$0xff] %v914_v30  ;;  %v2796_v35 = vadd.f32 %v2795_v32, %v2794_v27  ;;  %v2844_v36 = vadd.f32 %v2843_v34, %v2842_v28 }
 0x1d2   : > { %v2797_v37 = vpop.f32.mrf.mxu0  ;;  %v2845_v38 = vpop.f32.mrf.mxu1 }
 0x1d3   : > { %v899_v39 = vadd.f32 %v2796_v35, %v578_v31  ;;  %v915_v40 = vadd.f32 %v2844_v36, %v594_v33 }
 0x1d4   : > { %v2798_v42 = vpop.f32.mrf.mxu0  ;;  %v2846_v44 = vpop.f32.mrf.mxu1 }
 0x1d5   : > { %931 = vst [vmem:[#allocation2 + $0x8] sm:$0xff] %v899_v39  ;;  %947 = vst [vmem:[#allocation2 + $0x20] sm:$0xff] %v915_v40  ;;  %v2799_v45 = vadd.f32 %v2798_v42, %v2797_v37  ;;  %v2847_v46 = vadd.f32 %v2846_v44, %v2845_v38  ;;  %952 = sbr.rel (%p2534_p4) target bundleno = 910 (0x38e), region = 87 }
 0x1d7   : > { %v900_v47 = vadd.f32 %v2799_v45, %v579_v41  ;;  %v916_v48 = vadd.f32 %v2847_v46, %v595_v43 }
 0x1d9   : > { %932 = vst [vmem:[#allocation2 + $0x78] sm:$0xff] %v900_v47  ;;  %948 = vst [vmem:[#allocation2 + $0x98] sm:$0xff] %v916_v48 }
 0x1da   : > { %v985_v49 = vlaneseq  ;;  %v3809_v50 = vld [vmem:[#allocation2 + $0xd8] sm:$0xff]  ;;  %v3813_v52 = vld [vmem:[#allocation2 + $0xb0] sm:$0xff]  ;;  %v3818_v54 = vld [vmem:[#allocation2] sm:$0xff]  ;;  %v3488_v40 = vmov 0   ;;  %vm2261_vm1 = vcmask 7168  }
 0x1db   : > { %v3816_v53 = vld [vmem:[#allocation2 + $0x18] sm:$0xff]  ;;  %v3832_v59 = vld [vmem:[#allocation2 + $0x68] sm:$0xff]  ;;  %v3834_v60 = vld [vmem:[#allocation2 + $0x50] sm:$0xff]  ;;  %3159 = vset.pattern.permute.xlu1 %v3488_v40  ;;  %3158 = vset.pattern.permute.xlu0 %v3488_v40 }
 0x1dc   : > { %v3811_v51 = vand.u32 127, %v985_v49  ;;  %v3842_v63 = vld [vmem:[#allocation2 + $0x48] sm:$0xff]  ;;  %v3844_v0 = vld [vmem:[#allocation2 + $0x30] sm:$0xff]  ;;  %v3160_v1 = vld [vmem:[#allocation9 + $0x78] sm:$0xff]  }
 0x1dd   : > { %v3849_v3 = vld [vmem:[#allocation2 + $0x88] sm:$0xff]  ;;  %v3851_v4 = vld [vmem:[#allocation2 + $0x80] sm:$0xff]  ;;  %v3161_v5 = vld [vmem:[#allocation9 + $0x70] sm:$0xff]   ;;  %2896 = vmatprep.subr.bf16.mxu0 %v3160_v1 }
 0x1de   : > { %vm987_vm0 = vcmp.eq.s32.totalorder %v3811_v51, 8  ;;  %v3162_v7 = vld [vmem:[#allocation9 + $0x38] sm:$0xff]   ;;  %2897 = vmatpush3.bf16.msra.mxu0 %v3160_v1  ;;  %v3163_v8 = vld [vmem:[#allocation9 + $0x68] sm:$0xff]   ;;  %v3164_v10 = vld [vmem:[#allocation9 + $0x30] sm:$0xff]  }
 0x1df   : > { %v990_v55 = vsel %vm987_vm0, %v3809_v50, 0.0  ;;  %v988_v56 = vsel %vm987_vm0, %v3813_v52, 0.0  ;;  %v991_v57 = vsel %vm987_vm0, %v3816_v53, 0.0  ;;  %v989_v58 = vsel %vm987_vm0, %v3818_v54, 0.0  ;;  %v3856_v9 = vld [vmem:[#allocation2 + $0xb8] sm:$0xff]  ;;  %2898 = vmatprep.subr.bf16.mxu0 %v3161_v5  ;;  %2944 = vmatprep.subr.bf16.mxu1 %v3162_v7  ;;  %v3858_v11 = vld [vmem:[#allocation2 + $0xe8] sm:$0xff] }
 0x1e0   : > { %1024 = vadd.xlane.f32.xlu1 %v990_v55  ;;  %1020 = vadd.xlane.f32.xlu0 %v988_v56  ;;  %v993_v61 = vsel %vm987_vm0, %v3832_v59, 0.0  ;;  %v992_v62 = vsel %vm987_vm0, %v3834_v60, 0.0  ;;  %v995_v2 = vsel %vm987_vm0, %v3842_v63, 0.0  ;;  %v994_v6 = vsel %vm987_vm0, %v3844_v0, 0.0  ;;  %v3166_v14 = vld [vmem:[#allocation9 + $0x28] sm:$0xff]   ;;  %v3866_v15 = vld [vmem:[#allocation2 + $0xf0] sm:$0xff] }
 0x1e1   : > { %v997_v12 = vsel %vm987_vm0, %v3849_v3, 0.0  ;;  %v996_v13 = vsel %vm987_vm0, %v3851_v4, 0.0  ;;  %2945 = vmatpush3.bf16.msra.mxu1 %v3162_v7  ;;  %v3868_v16 = vld [vmem:[#allocation2 + $0x60] sm:$0xff]  ;;  %v999_v18 = vsel %vm987_vm0, %v3856_v9, 0.0  ;;  %v998_v19 = vsel %vm987_vm0, %v3858_v11, 0.0  ;;  %v3167_v20 = vld [vmem:[#allocation9 + $0x58] sm:$0xff]  }
 0x1e2   : > { %2899 = vmatpush3.bf16.msra.mxu0 %v3161_v5  ;;  %2946 = vmatprep.subr.bf16.mxu1 %v3164_v10  ;;  %v3165_v17 = vld [vmem:[#allocation9 + $0x60] sm:$0xff]   ;;  %v3876_v22 = vld [vmem:[#allocation2 + $0x78] sm:$0xff]  ;;  %v3878_v23 = vld [vmem:[#allocation2 + $0x8] sm:$0xff]  ;;  %v1001_v24 = vsel %vm987_vm0, %v3866_v15, 0.0  ;;  %v1000_v25 = vsel %vm987_vm0, %v3868_v16, 0.0 }
 0x1e3   : > { %2900 = vmatprep.subr.bf16.mxu0 %v3163_v8  ;;  %v3168_v21 = vld [vmem:[#allocation9 + $0x20] sm:$0xff]   ;;  %v3169_v26 = vld [vmem:[#allocation9 + $0x50] sm:$0xff]   ;;  %v3170_v27 = vld [vmem:[#allocation9 + $0x18] sm:$0xff]   ;;  %v1003_v30 = vsel %vm987_vm0, %v3876_v22, 0.0  ;;  %v1002_v31 = vsel %vm987_vm0, %v3878_v23, 0.0 }
 0x1e4   : > { %1026 = vadd.xlane.f32.xlu1 %v991_v57  ;;  %1022 = vadd.xlane.f32.xlu0 %v989_v58  ;;  %v3886_v28 = vld [vmem:[#allocation2 + $0x58] sm:$0xff]  ;;  %v3896_v32 = vld [vmem:[#allocation2 + $0xc8] sm:$0xff]  ;;  %v3172_v34 = vld [vmem:[#allocation9 + $0x10] sm:$0xff]  }
 0x1e5   : > { %2947 = vmatpush3.bf16.msra.mxu1 %v3164_v10  ;;  %v3888_v29 = vld [vmem:[#allocation2 + $0x38] sm:$0xff]  ;;  %v3171_v33 = vld [vmem:[#allocation9 + $0x48] sm:$0xff]   ;;  %v3175_v35 = vld [vmem:[%s3752_s10] sm:$0xff]   ;;  %v1005_v36 = vsel %vm987_vm0, %v3886_v28, 0.0  ;;  %v1007_v41 = vsel %vm987_vm0, %v3896_v32, 0.0 }
 0x1e6   : > { %2901 = vmatpush3.bf16.msra.mxu0 %v3163_v8  ;;  %2948 = vmatprep.subr.bf16.mxu1 %v3166_v14  ;;  %v1004_v37 = vsel %vm987_vm0, %v3888_v29, 0.0  ;;  %v3905_v38 = vld [vmem:[#allocation2 + $0x40] sm:$0xff]  ;;  %v3174_v42 = vld [vmem:[#allocation9 + $0x8] sm:$0xff]   ;;  %v3913_v44 = vld [vmem:[#allocation2 + $0x90] sm:$0xff] }
 0x1e7   : > { %2902 = vmatprep.subr.bf16.mxu0 %v3165_v17  ;;  %v3173_v39 = vld [vmem:[#allocation9 + $0x40] sm:$0xff]   ;;  %2912 = vmatprep.mubr.bf16.mxu0 %v3175_v35  ;;  %v1006_v43 = vsel %vm987_vm0, %v3905_v38, 0.0  ;;  %v1009_v47 = vsel %vm987_vm0, %v3913_v44, 0.0  ;;  %v3176_v49 = vld [vmem:[%s3752_s10 + $0x8] sm:$0xff]   ;;  %v3926_v56 = vld [vmem:[#allocation2 + $0x70] sm:$0xff] }
 0x1e8   : > { %1030 = vadd.xlane.f32.xlu1 %v993_v61  ;;  %1028 = vadd.xlane.f32.xlu0 %v992_v62  ;;  %v3915_v45 = vld [vmem:[#allocation2 + $0xe0] sm:$0xff]  ;;  %v3178_v57 = vld [vmem:[%s3752_s10 + $0x10] sm:$0xff]   ;;  %v1010_v61 = vsel %vm987_vm0, %v3926_v56, 0.0  ;;  %v3937_v1 = vld [vmem:[#allocation2 + $0xa8] sm:$0xff] }
 0x1e9   : > { %2949 = vmatpush3.bf16.msra.mxu1 %v3166_v14  ;;  %v3177_v46 = vld [vmem:[#allocation9] sm:$0xff]   ;;  %v1008_v48 = vsel %vm987_vm0, %v3915_v45, 0.0  ;;  %v3935_v62 = vld [vmem:[#allocation2 + $0xd0] sm:$0xff]  ;;  %v1012_v5 = vsel %vm987_vm0, %v3937_v1, 0.0  ;;  %v3946_v7 = vld [vmem:[#allocation2 + $0x28] sm:$0xff] }
 0x1ea   : > { %2903 = vmatpush3.bf16.msra.mxu0 %v3165_v17  ;;  %2950 = vmatprep.subr.bf16.mxu1 %v3168_v21  ;;  %v3924_v55 = vld [vmem:[#allocation2 + $0xc0] sm:$0xff]  ;;  %v3948_v8 = vld [vmem:[#allocation2 + $0x10] sm:$0xff]  ;;  %v3957_v14 = vld [vmem:[#allocation2 + $0xf8] sm:$0xff] }
 0x1eb   : > { %2904 = vmatprep.subr.bf16.mxu0 %v3167_v20  ;;  %v1011_v58 = vsel %vm987_vm0, %v3924_v55, 0.0  ;;  %v3180_v10 = vld [vmem:[%s3752_s10 + $0x20] sm:$0xff]   ;;  %v1878_v51 = vld [vmem:[%s3766_s15 + $0x8] sm:$0xff]  ;;  %v3187_v35 = vld [vmem:[%s3752_s10 + $0x58] sm:$0xff]  }
 0x1ec   : > { %1034 = vadd.xlane.f32.xlu1 %v995_v2  ;;  %1032 = vadd.xlane.f32.xlu0 %v994_v6  ;;  %v1013_v2 = vsel %vm987_vm0, %v3935_v62, 0.0  ;;  %v3179_v6 = vld [vmem:[%s3752_s10 + $0x18] sm:$0xff]   ;;  %v3959_v17 = vld [vmem:[#allocation2 + $0xa0] sm:$0xff] }
 0x1ed   : > { %2951 = vmatpush3.bf16.msra.mxu1 %v3168_v21  ;;  %v3968_v21 = vld [vmem:[#allocation2 + $0x98] sm:$0xff] }
 0x1ee   : > { %2905 = vmatpush3.bf16.msra.mxu0 %v3167_v20  ;;  %2952 = vmatprep.subr.bf16.mxu1 %v3170_v27  ;;  %v3181_v20 = vld [vmem:[%s3752_s10 + $0x28] sm:$0xff]   ;;  %v1880_v40 = vld [vmem:[%s3766_s15 + $0x18] sm:$0xff] }
 0x1ef   : > { %2906 = vmatprep.subr.bf16.mxu0 %v3169_v26 }
 0x1f0   : > { %1038 = vadd.xlane.f32.xlu1 %v997_v12  ;;  %1036 = vadd.xlane.f32.xlu0 %v996_v13  ;;  %v1015_v12 = vsel %vm987_vm0, %v3946_v7, 0.0  ;;  %v1014_v13 = vsel %vm987_vm0, %v3948_v8, 0.0 }
 0x1f1   : > { %2953 = vmatpush3.bf16.msra.mxu1 %v3170_v27 }
 0x1f2   : > { %2907 = vmatpush3.bf16.msra.mxu0 %v3169_v26  ;;  %2954 = vmatprep.subr.bf16.mxu1 %v3172_v34  ;;  %v1019_v26 = vsel %vm987_vm0, %v3968_v21, 0.0 }
 0x1f3   : > { %2908 = vmatprep.subr.bf16.mxu0 %v3171_v33 }
 0x1f4   : > { %1042 = vadd.xlane.f32.xlu1 %v999_v18  ;;  %1040 = vadd.xlane.f32.xlu0 %v998_v19  ;;  %v1017_v18 = vsel %vm987_vm0, %v3957_v14, 0.0  ;;  %v1016_v19 = vsel %vm987_vm0, %v3959_v17, 0.0 }
 0x1f5   : > { %2955 = vmatpush3.bf16.msra.mxu1 %v3172_v34  ;;  %v3186_v34 = vld [vmem:[%s3752_s10 + $0x50] sm:$0xff]  }
 0x1f6   : > { %2909 = vmatpush3.bf16.msra.mxu0 %v3171_v33  ;;  %2956 = vmatprep.subr.bf16.mxu1 %v3174_v42  ;;  %v3185_v33 = vld [vmem:[%s3752_s10 + $0x48] sm:$0xff]  }
 0x1f7   : > { %2910 = vmatprep.subr.bf16.mxu0 %v3173_v39 }
 0x1f8   : > { %1046 = vadd.xlane.f32.xlu1 %v1001_v24  ;;  %1044 = vadd.xlane.f32.xlu0 %v1000_v25  ;;  %v3970_v24 = vld [vmem:[#allocation2 + $0x20] sm:$0xff]  ;;  %v3182_v25 = vld [vmem:[%s3752_s10 + $0x30] sm:$0xff]  }
 0x1f9   : > { %2957 = vmatpush3.bf16.msra.mxu1 %v3174_v42  ;;  %v1018_v27 = vsel %vm987_vm0, %v3970_v24, 0.0  ;;  %v3189_v42 = vld [vmem:[%s3752_s10 + $0x68] sm:$0xff]  }
 0x1fa   : > { %2911 = vmatpush3.bf16.msra.mxu0 %v3173_v39  ;;  %2958 = vmatprep.subr.bf16.mxu1 %v3177_v46  ;;  %v1877_v39 = vld [vmem:[%s3766_s15] sm:$0xff] }
 0x1fc   : > { %1050 = vadd.xlane.f32.xlu1 %v1003_v30  ;;  %1048 = vadd.xlane.f32.xlu0 %v1002_v31  ;;  %v3183_v30 = vld [vmem:[%s3752_s10 + $0x38] sm:$0xff]   ;;  %v3184_v31 = vld [vmem:[%s3752_s10 + $0x40] sm:$0xff]  }
 0x1fd   : > { %2913 = vmatmul.mubr.bf16.vlgmr.msra.gmra.mxu0 %v3176_v49  ;;  %2959 = vmatpush3.bf16.msra.mxu1 %v3177_v46  ;;  %v3190_v46 = vld [vmem:[%s3752_s10 + $0x70] sm:$0xff]   ;;  %v1890_v49 = vld [vmem:[%s3766_s15 + $0x68] sm:$0xff] }
 0x1fe   : > { %2916 = vmatprep.mubr.bf16.mxu0 %v3178_v57  ;;  %v3191_v57 = vld [vmem:[%s3752_s10 + $0x78] sm:$0xff]  }
 0x200   : > { %1054 = vadd.xlane.f32.xlu1 %v1005_v36  ;;  %1052 = vadd.xlane.f32.xlu0 %v1004_v37  ;;  %v1879_v36 = vld [vmem:[%s3766_s15 + $0x10] sm:$0xff]  ;;  %v3188_v37 = vld [vmem:[%s3752_s10 + $0x60] sm:$0xff]  }
 0x204   : > { %1058 = vadd.xlane.f32.xlu1 %v1007_v41  ;;  %1056 = vadd.xlane.f32.xlu0 %v1006_v43  ;;  %v1886_v41 = vld [vmem:[%s3766_s15 + $0x48] sm:$0xff]  ;;  %v1881_v43 = vld [vmem:[%s3766_s15 + $0x20] sm:$0xff] }
 0x205   : > { %2917 = vmatmul.mubr.bf16.gmra.mxu0 %v3179_v6  ;;  %v1885_v6 = vld [vmem:[%s3766_s15 + $0x40] sm:$0xff] }
 0x206   : > { %2920 = vmatprep.mubr.bf16.mxu0 %v3180_v10  ;;  %v1896_v10 = vld [vmem:[%s3766_s15 + $0x98] sm:$0xff] }
 0x208   : > { %1062 = vadd.xlane.f32.xlu1 %v1009_v47  ;;  %1060 = vadd.xlane.f32.xlu0 %v1008_v48  ;;  %v1888_v47 = vld [vmem:[%s3766_s15 + $0x58] sm:$0xff]  ;;  %v1882_v48 = vld [vmem:[%s3766_s15 + $0x28] sm:$0xff] }
 0x20c   : > { %1066 = vadd.xlane.f32.xlu1 %v1011_v58  ;;  %1064 = vadd.xlane.f32.xlu0 %v1010_v61  ;;  %v1883_v58 = vld [vmem:[%s3766_s15 + $0x30] sm:$0xff]  ;;  %v1892_v61 = vld [vmem:[%s3766_s15 + $0x78] sm:$0xff] }
 0x20d   : > { %2921 = vmatmul.mubr.bf16.gmra.mxu0 %v3181_v20  ;;  %v1891_v20 = vld [vmem:[%s3766_s15 + $0x70] sm:$0xff] }
 0x20e   : > { %2924 = vmatprep.mubr.bf16.mxu0 %v3182_v25  ;;  %v1902_v25 = vld [vmem:[%s3766_s15 + $0xc8] sm:$0xff] }
 0x210   : > { %1070 = vadd.xlane.f32.xlu1 %v1013_v2  ;;  %1068 = vadd.xlane.f32.xlu0 %v1012_v5  ;;  %v1884_v2 = vld [vmem:[%s3766_s15 + $0x38] sm:$0xff]  ;;  %v1894_v5 = vld [vmem:[%s3766_s15 + $0x88] sm:$0xff] }
 0x214   : > { %1074 = vadd.xlane.f32.xlu1 %v1015_v12  ;;  %1072 = vadd.xlane.f32.xlu0 %v1014_v13  ;;  %v1887_v12 = vld [vmem:[%s3766_s15 + $0x50] sm:$0xff]  ;;  %v1898_v13 = vld [vmem:[%s3766_s15 + $0xa8] sm:$0xff] }
 0x215   : > { %2925 = vmatmul.mubr.bf16.gmra.mxu0 %v3183_v30  ;;  %v1895_v30 = vld [vmem:[%s3766_s15 + $0x90] sm:$0xff] }
 0x216   : > { %2928 = vmatprep.mubr.bf16.mxu0 %v3184_v31  ;;  %v1906_v31 = vld [vmem:[%s3766_s15 + $0xe8] sm:$0xff] }
 0x218   : > { %1078 = vadd.xlane.f32.xlu1 %v1017_v18  ;;  %1076 = vadd.xlane.f32.xlu0 %v1016_v19  ;;  %v1889_v18 = vld [vmem:[%s3766_s15 + $0x60] sm:$0xff]  ;;  %v1900_v19 = vld [vmem:[%s3766_s15 + $0xb8] sm:$0xff] }
 0x21c   : > { %1082 = vadd.xlane.f32.xlu1 %v1019_v26  ;;  %1080 = vadd.xlane.f32.xlu0 %v1018_v27  ;;  %v1893_v26 = vld [vmem:[%s3766_s15 + $0x80] sm:$0xff]  ;;  %v1904_v27 = vld [vmem:[%s3766_s15 + $0xd8] sm:$0xff] }
 0x21d   : > { %2929 = vmatmul.mubr.bf16.gmra.mxu0 %v3185_v33  ;;  %v1897_v33 = vld [vmem:[%s3766_s15 + $0xa0] sm:$0xff] }
 0x21e   : > { %2932 = vmatprep.mubr.bf16.mxu0 %v3186_v34  ;;  %v1908_v34 = vld [vmem:[%s3766_s15 + $0xf8] sm:$0xff] }
 0x225   : > { %2933 = vmatmul.mubr.bf16.gmra.mxu0 %v3187_v35  ;;  %v1901_v35 = vld [vmem:[%s3766_s15 + $0xc0] sm:$0xff] }
 0x226   : > { %2936 = vmatprep.mubr.bf16.mxu0 %v3188_v37 }
 0x22d   : > { %1916 = vperm.xlu1 %3159, %v1878_v51   ;;  %2937 = vmatmul.mubr.bf16.gmra.mxu0 %v3189_v42  ;;  %v1899_v51 = vld [vmem:[%s3766_s15 + $0xb0] sm:$0xff] }
 0x22e   : > { %2940 = vmatprep.mubr.bf16.mxu0 %v3190_v46 }
 0x231   : > { %1921 = vperm.xlu1 %3159, %v1879_v36  }
 0x232   : > { %1911 = vperm.xlu0 %3158, %v1877_v39  }
 0x235   : > { %1926 = vperm.xlu1 %3159, %v1880_v40   ;;  %2941 = vmatmul.mubr.bf16.gmra.mxu0 %v3191_v57 }
 0x236   : > { %1956 = vperm.xlu0 %3158, %v1886_v41   ;;  %v1903_v41 = vld [vmem:[%s3766_s15 + $0xd0] sm:$0xff] }
 0x239   : > { %1931 = vperm.xlu1 %3159, %v1881_v43  }
 0x23a   : > { %1966 = vperm.xlu0 %3158, %v1888_v47  }
 0x23d   : > { %1936 = vperm.xlu1 %3159, %v1882_v48   ;;  %v1905_v48 = vld [vmem:[%s3766_s15 + $0xe0] sm:$0xff] }
 0x23e   : > { %1976 = vperm.xlu0 %3158, %v1890_v49  }
 0x241   : > { %1941 = vperm.xlu1 %3159, %v1883_v58  }
 0x242   : > { %1986 = vperm.xlu0 %3158, %v1892_v61  }
 0x245   : > { %1946 = vperm.xlu1 %3159, %v1884_v2   ;;  %v1907_v2 = vld [vmem:[%s3766_s15 + $0xf0] sm:$0xff] }
 0x246   : > { %1996 = vperm.xlu0 %3158, %v1894_v5  }
 0x249   : > { %1951 = vperm.xlu1 %3159, %v1885_v6  }
 0x24a   : > { %2006 = vperm.xlu0 %3158, %v1896_v10  }
 0x24d   : > { %1961 = vperm.xlu1 %3159, %v1887_v12  }
 0x24e   : > { %2016 = vperm.xlu0 %3158, %v1898_v13  }
 0x251   : > { %1971 = vperm.xlu1 %3159, %v1889_v18  }
 0x252   : > { %2026 = vperm.xlu0 %3158, %v1900_v19  }
 0x255   : > { %1981 = vperm.xlu1 %3159, %v1891_v20  }
 0x256   : > { %2036 = vperm.xlu0 %3158, %v1902_v25  }
 0x259   : > { %1991 = vperm.xlu1 %3159, %v1893_v26  }
 0x25a   : > { %2046 = vperm.xlu0 %3158, %v1904_v27  }
 0x25d   : > { %2001 = vperm.xlu1 %3159, %v1895_v30  }
 0x25e   : > { %2056 = vperm.xlu0 %3158, %v1906_v31  }
 0x261   : > { %2011 = vperm.xlu1 %3159, %v1897_v33  }
 0x262   : > { %2066 = vperm.xlu0 %3158, %v1908_v34  }
 0x265   : > { %2021 = vperm.xlu1 %3159, %v1899_v51  }
 0x269   : > { %v1025_v36 = vpop.xlane.xlu1 %1024  ;;  %v1021_v37 = vpop.xlane.xlu0 %1020  ;;  %2031 = vperm.xlu1 %3159, %v1901_v35  }
 0x26a   : > { %v1086_v39 = vmax.f32 %v1025_v36, 1.0  ;;  %v1084_v40 = vmax.f32 %v1021_v37, 1.0 }
 0x26c   : > { %3192 = vrcp.f32 %v1086_v39 }
 0x26d   : > { %3194 = vrcp.f32 %v1084_v40  ;;  %v1027_v42 = vpop.xlane.xlu1 %1026  ;;  %v1023_v43 = vpop.xlane.xlu0 %1022  ;;  %2041 = vperm.xlu1 %3159, %v1903_v41  }
 0x26e   : > { %v1087_v46 = vmax.f32 %v1027_v42, 1.0  ;;  %v1085_v47 = vmax.f32 %v1023_v43, 1.0 }
 0x270   : > { %3196 = vrcp.f32 %v1087_v46 }
 0x271   : > { %3198 = vrcp.f32 %v1085_v47  ;;  %v1031_v49 = vpop.xlane.xlu1 %1030  ;;  %v1029_v57 = vpop.xlane.xlu0 %1028  ;;  %2051 = vperm.xlu1 %3159, %v1905_v48  }
 0x272   : > { %v1089_v58 = vmax.f32 %v1031_v49, 1.0  ;;  %v1088_v61 = vmax.f32 %v1029_v57, 1.0 }
 0x274   : > { %3200 = vrcp.f32 %v1089_v58 }
 0x275   : > { %3202 = vrcp.f32 %v1088_v61  ;;  %v1035_v5 = vpop.xlane.xlu1 %1034  ;;  %v1033_v6 = vpop.xlane.xlu0 %1032  ;;  %2061 = vperm.xlu1 %3159, %v1907_v2  }
 0x276   : > { %v1091_v10 = vmax.f32 %v1035_v5, 1.0  ;;  %v1090_v12 = vmax.f32 %v1033_v6, 1.0 }
 0x278   : > { %3204 = vrcp.f32 %v1091_v10 }
 0x279   : > { %v3193_v13 = vpop.eup %3192  ;;  %3206 = vrcp.f32 %v1090_v12  ;;  %v1039_v18 = vpop.xlane.xlu1 %1038 }
 0x27a   : > { %v1037_v19 = vpop.xlane.xlu0 %1036  ;;  %v3195_v20 = vpop.eup %3194  ;;  %2264 = vst.msk [vmem:[%s3771_s4 + $0x10] sm:$0xff] %vm2261_vm1, %v3193_v13  ;;  %v1093_v25 = vmax.f32 %v1039_v18, 1.0  ;;  %v1182_v35 = vmul.f32 %v3193_v13, %v3809_v50 }
 0x27b   : > { %v1092_v26 = vmax.f32 %v1037_v19, 1.0  ;;  %2262 = vst.msk [vmem:[%s3771_s4] sm:$0xff] %vm2261_vm1, %v3195_v20  ;;  %v1180_v37 = vmul.f32 %v3195_v20, %v3813_v52 }
 0x27c   : > { %3208 = vrcp.f32 %v1093_v25 }
 0x27d   : > { %v3197_v27 = vpop.eup %3196  ;;  %3210 = vrcp.f32 %v1092_v26  ;;  %v1043_v30 = vpop.xlane.xlu1 %1042 }
 0x27e   : > { %v1041_v31 = vpop.xlane.xlu0 %1040  ;;  %v3199_v33 = vpop.eup %3198  ;;  %2265 = vst.msk [vmem:[%s3771_s4 + $0x18] sm:$0xff] %vm2261_vm1, %v3197_v27  ;;  %v1095_v34 = vmax.f32 %v1043_v30, 1.0  ;;  %v1183_v36 = vmul.f32 %v3197_v27, %v3816_v53 }
 0x27f   : > { %v1094_v51 = vmax.f32 %v1041_v31, 1.0  ;;  %2263 = vst.msk [vmem:[%s3771_s4 + $0x8] sm:$0xff] %vm2261_vm1, %v3199_v33  ;;  %v1181_v39 = vmul.f32 %v3199_v33, %v3818_v54 }
 0x280   : > { %3212 = vrcp.f32 %v1095_v34  ;;  %v1213_v40 = vpack.c.bf16 %v1183_v36, %v1182_v35 }
 0x281   : > { %v3201_v41 = vpop.eup %3200  ;;  %3214 = vrcp.f32 %v1094_v51  ;;  %v1047_v42 = vpop.xlane.xlu1 %1046  ;;  %v1212_v43 = vpack.c.bf16 %v1181_v39, %v1180_v37 }
 0x282   : > { %v1045_v46 = vpop.xlane.xlu0 %1044  ;;  %v3203_v47 = vpop.eup %3202  ;;  %2267 = vst.msk [vmem:[%s3771_s4 + $0x28] sm:$0xff] %vm2261_vm1, %v3201_v41  ;;  %v1097_v50 = vmax.f32 %v1047_v42, 1.0  ;;  %v1185_v48 = vmul.f32 %v3201_v41, %v3832_v59 }
 0x283   : > { %v1096_v53 = vmax.f32 %v1045_v46, 1.0  ;;  %2266 = vst.msk [vmem:[%s3771_s4 + $0x20] sm:$0xff] %vm2261_vm1, %v3203_v47  ;;  %2960 = vmatprep.mubr.bf16.mxu1 %v1212_v43  ;;  %v1184_v52 = vmul.f32 %v3203_v47, %v3834_v60 }
 0x284   : > { %3216 = vrcp.f32 %v1097_v50  ;;  %2961 = vmatmul.mubr.bf16.vlgmr.msra.gmra.mxu1 %v1213_v40 }
 0x285   : > { %v3205_v54 = vpop.eup %3204  ;;  %3218 = vrcp.f32 %v1096_v53  ;;  %v1051_v49 = vpop.xlane.xlu1 %1050  ;;  %v1214_v58 = vpack.c.bf16 %v1185_v48, %v1184_v52 }
 0x286   : > { %v1049_v57 = vpop.xlane.xlu0 %1048  ;;  %v3207_v61 = vpop.eup %3206  ;;  %2269 = vst.msk [vmem:[%s3771_s4 + $0x38] sm:$0xff] %vm2261_vm1, %v3205_v54  ;;  %v1099_v2 = vmax.f32 %v1051_v49, 1.0  ;;  %v1187_v59 = vmul.f32 %v3205_v54, %v3842_v63 }
 0x287   : > { %v1098_v5 = vmax.f32 %v1049_v57, 1.0  ;;  %2268 = vst.msk [vmem:[%s3771_s4 + $0x30] sm:$0xff] %vm2261_vm1, %v3207_v61  ;;  %2964 = vmatprep.mubr.bf16.mxu1 %v1214_v58  ;;  %v1186_v60 = vmul.f32 %v3207_v61, %v3844_v0 }
 0x288   : > { %3220 = vrcp.f32 %v1099_v2 }
 0x289   : > { %v3209_v6 = vpop.eup %3208  ;;  %3222 = vrcp.f32 %v1098_v5  ;;  %v1055_v10 = vpop.xlane.xlu1 %1054  ;;  %v1215_v13 = vpack.c.bf16 %v1187_v59, %v1186_v60 }
 0x28a   : > { %v1053_v12 = vpop.xlane.xlu0 %1052  ;;  %v3211_v18 = vpop.eup %3210  ;;  %2271 = vst.msk [vmem:[%s3771_s4 + $0x48] sm:$0xff] %vm2261_vm1, %v3209_v6  ;;  %v1101_v19 = vmax.f32 %v1055_v10, 1.0  ;;  %v1189_v63 = vmul.f32 %v3209_v6, %v3849_v3 }
 0x28b   : > { %v1100_v20 = vmax.f32 %v1053_v12, 1.0  ;;  %2270 = vst.msk [vmem:[%s3771_s4 + $0x40] sm:$0xff] %vm2261_vm1, %v3211_v18  ;;  %v1188_v25 = vmul.f32 %v3211_v18, %v3851_v4 }
 0x28c   : > { %3224 = vrcp.f32 %v1101_v19  ;;  %2965 = vmatmul.mubr.bf16.gmra.mxu1 %v1215_v13 }
 0x28d   : > { %v3213_v0 = vpop.eup %3212  ;;  %3226 = vrcp.f32 %v1100_v20  ;;  %v1059_v26 = vpop.xlane.xlu1 %1058  ;;  %v1216_v30 = vpack.c.bf16 %v1189_v63, %v1188_v25 }
 0x28e   : > { %v1057_v27 = vpop.xlane.xlu0 %1056  ;;  %v3215_v31 = vpop.eup %3214  ;;  %2273 = vst.msk [vmem:[%s3771_s4 + $0x58] sm:$0xff] %vm2261_vm1, %v3213_v0  ;;  %v1103_v33 = vmax.f32 %v1059_v26, 1.0  ;;  %v1191_v3 = vmul.f32 %v3213_v0, %v3856_v9 }
 0x28f   : > { %v1102_v34 = vmax.f32 %v1057_v27, 1.0  ;;  %2272 = vst.msk [vmem:[%s3771_s4 + $0x50] sm:$0xff] %vm2261_vm1, %v3215_v31  ;;  %2968 = vmatprep.mubr.bf16.mxu1 %v1216_v30  ;;  %v1190_v4 = vmul.f32 %v3215_v31, %v3858_v11 }
 0x290   : > { %3228 = vrcp.f32 %v1103_v33 }
 0x291   : > { %v3217_v51 = vpop.eup %3216  ;;  %3230 = vrcp.f32 %v1102_v34  ;;  %v1063_v35 = vpop.xlane.xlu1 %1062  ;;  %v1217_v37 = vpack.c.bf16 %v1191_v3, %v1190_v4 }
 0x292   : > { %v1061_v36 = vpop.xlane.xlu0 %1060  ;;  %v3219_v39 = vpop.eup %3218  ;;  %2275 = vst.msk [vmem:[%s3771_s4 + $0x68] sm:$0xff] %vm2261_vm1, %v3217_v51  ;;  %v1105_v40 = vmax.f32 %v1063_v35, 1.0  ;;  %v1193_v9 = vmul.f32 %v3217_v51, %v3866_v15 }
 0x293   : > { %v1104_v41 = vmax.f32 %v1061_v36, 1.0  ;;  %2274 = vst.msk [vmem:[%s3771_s4 + $0x60] sm:$0xff] %vm2261_vm1, %v3219_v39  ;;  %v1192_v42 = vmul.f32 %v3219_v39, %v3868_v16 }
 0x294   : > { %3232 = vrcp.f32 %v1105_v40  ;;  %2969 = vmatmul.mubr.bf16.gmra.mxu1 %v1217_v37 }
 0x295   : > { %v3221_v11 = vpop.eup %3220  ;;  %3234 = vrcp.f32 %v1104_v41  ;;  %v1067_v43 = vpop.xlane.xlu1 %1066  ;;  %v1218_v47 = vpack.c.bf16 %v1193_v9, %v1192_v42 }
 0x296   : > { %v1065_v46 = vpop.xlane.xlu0 %1064  ;;  %v3223_v50 = vpop.eup %3222  ;;  %2277 = vst.msk [vmem:[%s3771_s4 + $0x78] sm:$0xff] %vm2261_vm1, %v3221_v11  ;;  %v1107_v53 = vmax.f32 %v1067_v43, 1.0  ;;  %v1195_v15 = vmul.f32 %v3221_v11, %v3876_v22 }
 0x297   : > { %v1106_v48 = vmax.f32 %v1065_v46, 1.0  ;;  %2276 = vst.msk [vmem:[%s3771_s4 + $0x70] sm:$0xff] %vm2261_vm1, %v3223_v50  ;;  %2972 = vmatprep.mubr.bf16.mxu1 %v1218_v47  ;;  %v1194_v16 = vmul.f32 %v3223_v50, %v3878_v23 }
 0x298   : > { %3236 = vrcp.f32 %v1107_v53 }
 0x299   : > { %v3225_v52 = vpop.eup %3224  ;;  %3238 = vrcp.f32 %v1106_v48  ;;  %v1071_v54 = vpop.xlane.xlu1 %1070  ;;  %v1219_v57 = vpack.c.bf16 %v1195_v15, %v1194_v16 }
 0x29a   : > { %v1069_v49 = vpop.xlane.xlu0 %1068  ;;  %v3227_v58 = vpop.eup %3226  ;;  %2279 = vst.msk [vmem:[%s3771_s4 + $0x88] sm:$0xff] %vm2261_vm1, %v3225_v52  ;;  %v1109_v61 = vmax.f32 %v1071_v54, 1.0  ;;  %v1197_v22 = vmul.f32 %v3225_v52, %v3886_v28 }
 0x29b   : > { %v1108_v2 = vmax.f32 %v1069_v49, 1.0  ;;  %2278 = vst.msk [vmem:[%s3771_s4 + $0x80] sm:$0xff] %vm2261_vm1, %v3227_v58  ;;  %v1196_v5 = vmul.f32 %v3227_v58, %v3888_v29 }
 0x29c   : > { %3240 = vrcp.f32 %v1109_v61  ;;  %2973 = vmatmul.mubr.bf16.gmra.mxu1 %v1219_v57 }
 0x29d   : > { %v3229_v23 = vpop.eup %3228  ;;  %3242 = vrcp.f32 %v1108_v2  ;;  %v1075_v59 = vpop.xlane.xlu1 %1074  ;;  %v1220_v6 = vpack.c.bf16 %v1197_v22, %v1196_v5 }
 0x29e   : > { %v1073_v60 = vpop.xlane.xlu0 %1072  ;;  %v3231_v10 = vpop.eup %3230  ;;  %2281 = vst.msk [vmem:[%s3771_s4 + $0x98] sm:$0xff] %vm2261_vm1, %v3229_v23  ;;  %v1111_v12 = vmax.f32 %v1075_v59, 1.0  ;;  %v1199_v28 = vmul.f32 %v3229_v23, %v3896_v32 }
 0x29f   : > { %v1110_v13 = vmax.f32 %v1073_v60, 1.0  ;;  %2280 = vst.msk [vmem:[%s3771_s4 + $0x90] sm:$0xff] %vm2261_vm1, %v3231_v10  ;;  %2976 = vmatprep.mubr.bf16.mxu1 %v1220_v6  ;;  %v1198_v29 = vmul.f32 %v3231_v10, %v3905_v38 }
 0x2a0   : > { %3244 = vrcp.f32 %v1111_v12 }
 0x2a1   : > { %v3233_v18 = vpop.eup %3232  ;;  %3246 = vrcp.f32 %v1110_v13  ;;  %v1079_v19 = vpop.xlane.xlu1 %1078  ;;  %v1221_v63 = vpack.c.bf16 %v1199_v28, %v1198_v29 }
 0x2a2   : > { %v1077_v20 = vpop.xlane.xlu0 %1076  ;;  %v3235_v25 = vpop.eup %3234  ;;  %2283 = vst.msk [vmem:[%s3771_s4 + $0xa8] sm:$0xff] %vm2261_vm1, %v3233_v18  ;;  %v1113_v0 = vmax.f32 %v1079_v19, 1.0  ;;  %v1201_v32 = vmul.f32 %v3233_v18, %v3913_v44  ;;  %v4143_v18 = vld [vmem:[%s4406_s0] ss:$0 sm:$0xff] }
 0x2a3   : > { %v1112_v26 = vmax.f32 %v1077_v20, 1.0  ;;  %2282 = vst.msk [vmem:[%s3771_s4 + $0xa0] sm:$0xff] %vm2261_vm1, %v3235_v25  ;;  %v1200_v27 = vmul.f32 %v3235_v25, %v3915_v45 }
 0x2a4   : > { %3248 = vrcp.f32 %v1113_v0  ;;  %2977 = vmatmul.mubr.bf16.gmra.mxu1 %v1221_v63 }
 0x2a5   : > { %v3237_v38 = vpop.eup %3236  ;;  %3250 = vrcp.f32 %v1112_v26  ;;  %v1083_v30 = vpop.xlane.xlu1 %1082  ;;  %v1222_v33 = vpack.c.bf16 %v1201_v32, %v1200_v27 }
 0x2a6   : > { %v1081_v31 = vpop.xlane.xlu0 %1080  ;;  %v3239_v34 = vpop.eup %3238  ;;  %2285 = vst.msk [vmem:[%s3771_s4 + $0xb8] sm:$0xff] %vm2261_vm1, %v3237_v38  ;;  %v1115_v3 = vmax.f32 %v1083_v30, 1.0  ;;  %v1203_v44 = vmul.f32 %v3237_v38, %v3924_v55 }
 0x2a7   : > { %v1114_v4 = vmax.f32 %v1081_v31, 1.0  ;;  %2284 = vst.msk [vmem:[%s3771_s4 + $0xb0] sm:$0xff] %vm2261_vm1, %v3239_v34  ;;  %2980 = vmatprep.mubr.bf16.mxu1 %v1222_v33  ;;  %v1202_v45 = vmul.f32 %v3239_v34, %v3926_v56 }
 0x2a8   : > { %3252 = vrcp.f32 %v1115_v3 }
 0x2a9   : > { %v3241_v51 = vpop.eup %3240  ;;  %3254 = vrcp.f32 %v1114_v4  ;;  %v1223_v35 = vpack.c.bf16 %v1203_v44, %v1202_v45  ;;  %v1917_v54 = vpop.permute.xlu1 %1916 }
 0x2aa   : > { %v3243_v36 = vpop.eup %3242  ;;  %2287 = vst.msk [vmem:[%s3771_s4 + $0xc8] sm:$0xff] %vm2261_vm1, %v3241_v51  ;;  %v1205_v37 = vmul.f32 %v3241_v51, %v3935_v62 }
 0x2ab   : > { %2286 = vst.msk [vmem:[%s3771_s4 + $0xc0] sm:$0xff] %vm2261_vm1, %v3243_v36  ;;  %v1204_v55 = vmul.f32 %v3243_v36, %v3937_v1 }
 0x2ac   : > { %2981 = vmatmul.mubr.bf16.gmra.mxu1 %v1223_v35 }
 0x2ad   : > { %v3245_v39 = vpop.eup %3244  ;;  %v1224_v40 = vpack.c.bf16 %v1205_v37, %v1204_v55  ;;  %v1922_v57 = vpop.permute.xlu1 %1921 }
 0x2ae   : > { %v3247_v56 = vpop.eup %3246  ;;  %2289 = vst.msk [vmem:[%s3771_s4 + $0xd8] sm:$0xff] %vm2261_vm1, %v3245_v39  ;;  %v1207_v41 = vmul.f32 %v3245_v39, %v3946_v7  ;;  %v1912_v13 = vpop.permute.xlu0 %1911 }
 0x2af   : > { %2288 = vst.msk [vmem:[%s3771_s4 + $0xd0] sm:$0xff] %vm2261_vm1, %v3247_v56  ;;  %2984 = vmatprep.mubr.bf16.mxu1 %v1224_v40  ;;  %v1206_v62 = vmul.f32 %v3247_v56, %v3948_v8 }
 0x2b1   : > { %v3249_v9 = vpop.eup %3248  ;;  %v1225_v42 = vpack.c.bf16 %v1207_v41, %v1206_v62 }
 0x2b2   : > { %v3251_v11 = vpop.eup %3250  ;;  %2291 = vst.msk [vmem:[%s3771_s4 + $0xe8] sm:$0xff] %vm2261_vm1, %v3249_v9  ;;  %v1209_v1 = vmul.f32 %v3249_v9, %v3957_v14  ;;  %v4147_v20 = vpop.permute.xlu0 %1956 }
 0x2b3   : > { %2290 = vst.msk [vmem:[%s3771_s4 + $0xe0] sm:$0xff] %vm2261_vm1, %v3251_v11  ;;  %v1208_v43 = vmul.f32 %v3251_v11, %v3959_v17 }
 0x2b4   : > { %2985 = vmatmul.mubr.bf16.gmra.mxu1 %v1225_v42 }
 0x2b5   : > { %v3253_v46 = vpop.eup %3252  ;;  %v1226_v7 = vpack.c.bf16 %v1209_v1, %v1208_v43 }
 0x2b6   : > { %v3255_v47 = vpop.eup %3254  ;;  %2293 = vst.msk [vmem:[%s3771_s4 + $0xf8] sm:$0xff] %vm2261_vm1, %v3253_v46  ;;  %v1211_v50 = vmul.f32 %v3253_v46, %v3968_v21  ;;  %v1927_v21 = vpop.permute.xlu1 %1926 }
 0x2b7   : > { %2292 = vst.msk [vmem:[%s3771_s4 + $0xf0] sm:$0xff] %vm2261_vm1, %v3255_v47  ;;  %2988 = vmatprep.mubr.bf16.mxu1 %v1226_v7  ;;  %v1210_v8 = vmul.f32 %v3255_v47, %v3970_v24  ;;  %v4157_v3 = vpop.permute.xlu0 %1966 }
 0x2b9   : > { %v1227_v53 = vpack.c.bf16 %v1211_v50, %v1210_v8 }
 0x2ba   : > { %v4120_v22 = vpop.permute.xlu1 %1931 }
 0x2bb   : > { %v4166_v43 = vpop.permute.xlu0 %1976 }
 0x2bc   : > { %2989 = vmatmul.mubr.bf16.gmra.mxu1 %v1227_v53 }
 0x2bd   : > { %v2914_v14 = vpop.f32.mrf.mxu0 }
 0x2be   : > { %v4126_v23 = vpop.permute.xlu1 %1936 }
 0x2bf   : > { %v1470_v48 = vpop.f32.mrf.mxu0 }
 0x2c1   : > { %v2915_v15 = vpop.f32.mrf.mxu0 }
 0x2c2   : > { %v4130_v60 = vpop.permute.xlu1 %1941 }
 0x2c3   : > { %v1473_v16 = vpop.f32.mrf.mxu0 }
 0x2c5   : > { %v2918_v17 = vpop.f32.mrf.mxu0 }
 0x2c6   : > { %v4136_v12 = vpop.permute.xlu1 %1946 }
 0x2c7   : > { %v1486_v52 = vpop.f32.mrf.mxu0 }
 0x2c9   : > { %v2919_v49 = vpop.f32.mrf.mxu0 }
 0x2ca   : > { %v4145_v19 = vpop.permute.xlu1 %1951 }
 0x2cb   : > { %v1489_v58 = vpop.f32.mrf.mxu0 }
 0x2cd   : > { %v4116_v61 = vpop.f32.mrf.mxu0 }
 0x2ce   : > { %v4155_v34 = vpop.permute.xlu1 %1961 }
 0x2cf   : > { %v4118_v2 = vpop.f32.mrf.mxu0 }
 0x2d1   : > { %v4122_v24 = vpop.f32.mrf.mxu0 }
 0x2d2   : > { %v4164_v1 = vpop.permute.xlu1 %1971 }
 0x2d3   : > { %v4124_v5 = vpop.f32.mrf.mxu0 }
 0x2d5   : > { %v4128_v59 = vpop.f32.mrf.mxu0 }
 0x2d7   : > { %v4132_v6 = vpop.f32.mrf.mxu0 }
 0x2d9   : > { %v4134_v10 = vpop.f32.mrf.mxu0 }
 0x2db   : > { %v4138_v28 = vpop.f32.mrf.mxu0 }
 0x2dd   : > { %v4149_v0 = vpop.f32.mrf.mxu0 }
 0x2df   : > { %v4153_v33 = vpop.f32.mrf.mxu0 }
 0x2e1   : > { %v4161_v40 = vpop.f32.mrf.mxu0 }
 0x344   : > { %v2962_v29 = vpop.f32.mrf.mxu1 }
 0x345   : > { %v1688_v63 = vadd.f32 %v2962_v29, %v2914_v14  ;;  %v4169_v14 = vpop.f32.mrf.mxu0 }
 0x346   : > { %v1679_v25 = vpop.f32.mrf.mxu1 }
 0x347   : > { %v1815_v26 = vadd.f32 %v4143_v18, %v1688_v63  ;;  %v1680_v32 = vadd.f32 %v1679_v25, %v1470_v48  ;;  %v4176_v63 = vpop.f32.mrf.mxu0  ;;  %v1987_v25 = vpop.permute.xlu0 %1986 }
 0x348   : > { %v2963_v27 = vpop.f32.mrf.mxu1 }
 0x349   : > { %v1813_v38 = vadd.f32 %v4143_v18, %v1680_v32  ;;  %v1691_v30 = vadd.f32 %v2963_v27, %v2915_v15  ;;  %v1847_v4 = vmax.f32 %v1815_v26, 0.0 }
 0x34a   : > { %v1682_v31 = vpop.f32.mrf.mxu1 }
 0x34b   : > { %v1816_v44 = vadd.f32 %v4143_v18, %v1691_v30  ;;  %v1683_v45 = vadd.f32 %v1682_v31, %v1473_v16  ;;  %v1845_v35 = vmax.f32 %v1813_v38, 0.0  ;;  %v2071_v56 = vmul.f32 %v1922_v57, %v1847_v4 }
 0x34c   : > { %v2966_v51 = vpop.f32.mrf.mxu1 }
 0x34d   : > { %v1848_v36 = vmax.f32 %v1816_v44, 0.0  ;;  %v1814_v37 = vadd.f32 %v4143_v18, %v1683_v45  ;;  %v1704_v55 = vadd.f32 %v2966_v51, %v2918_v17  ;;  %v2069_v46 = vmul.f32 %v1912_v13, %v1845_v35  ;;  %v4186_v35 = vpop.f32.mrf.mxu0 }
 0x34e   : > { %v1695_v39 = vpop.f32.mrf.mxu1 }
 0x34f   : > { %v2072_v41 = vmul.f32 %v1927_v21, %v1848_v36  ;;  %v1846_v62 = vmax.f32 %v1814_v37, 0.0  ;;  %v1696_v9 = vadd.f32 %v1695_v39, %v1486_v52  ;;  %v1819_v42 = vadd.f32 %v4143_v18, %v1704_v55 }
 0x350   : > { %v2967_v11 = vpop.f32.mrf.mxu1 }
 0x351   : > { %v2649_v7 = vpack.c.bf16 %v2072_v41, %v2071_v56  ;;  %v2070_v47 = vmul.f32 %v1917_v54, %v1846_v62  ;;  %v1817_v50 = vadd.f32 %v4143_v18, %v1696_v9  ;;  %v1707_v8 = vadd.f32 %v2967_v11, %v2919_v49  ;;  %v1982_v49 = vpop.permute.xlu1 %1981  ;;  %v4198_v62 = vpop.f32.mrf.mxu0 }
 0x352   : > { %v1698_v53 = vpop.f32.mrf.mxu1  ;;  %v1851_v16 = vmax.f32 %v1819_v42, 0.0 }
 0x353   : > { %2721 = vst [vmem:[%s3773_s7 + $0x8] sm:$0xff] %v2649_v7   ;;  %v2644_v48 = vpack.c.bf16 %v2070_v47, %v2069_v46  ;;  %v1699_v15 = vadd.f32 %v1698_v53, %v1489_v58  ;;  %v1820_v17 = vadd.f32 %v4143_v18, %v1707_v8  ;;  %v1849_v57 = vmax.f32 %v1817_v50, 0.0 }
 0x354   : > { %v2970_v52 = vpop.f32.mrf.mxu1  ;;  %v2075_v27 = vmul.f32 %v4130_v60, %v1851_v16 }
 0x355   : > { %2645 = vst [vmem:[%s3773_s7] sm:$0xff] %v2644_v48   ;;  %v1818_v21 = vadd.f32 %v4143_v18, %v1699_v15  ;;  %v1720_v13 = vadd.f32 %v2970_v52, %v4116_v61  ;;  %v1852_v54 = vmax.f32 %v1820_v17, 0.0  ;;  %v2073_v61 = vmul.f32 %v4120_v22, %v1849_v57  ;;  %v4191_v55 = vpop.permute.xlu1 %1991  ;;  %v4193_v22 = vpop.permute.xlu0 %1996 }
 0x356   : > { %v1711_v29 = vpop.f32.mrf.mxu1 }
 0x357   : > { %v1850_v26 = vmax.f32 %v1818_v21, 0.0  ;;  %v1823_v58 = vadd.f32 %v4143_v18, %v1720_v13  ;;  %v1712_v32 = vadd.f32 %v1711_v29, %v4118_v2  ;;  %v2076_v38 = vmul.f32 %v4136_v12, %v1852_v54 }
 0x358   : > { %v2971_v30 = vpop.f32.mrf.mxu1 }
 0x359   : > { %v2074_v31 = vmul.f32 %v4126_v23, %v1850_v26  ;;  %v1723_v4 = vadd.f32 %v2971_v30, %v4122_v24  ;;  %v2659_v44 = vpack.c.bf16 %v2076_v38, %v2075_v27  ;;  %v1821_v45 = vadd.f32 %v4143_v18, %v1712_v32  ;;  %v2007_v15 = vpop.permute.xlu0 %2006 }
 0x35a   : > { %v1714_v51 = vpop.f32.mrf.mxu1  ;;  %v1855_v2 = vmax.f32 %v1823_v58, 0.0 }
 0x35b   : > { %v2654_v36 = vpack.c.bf16 %v2074_v31, %v2073_v61  ;;  %v1824_v60 = vadd.f32 %v4143_v18, %v1723_v4  ;;  %2723 = vst [vmem:[%s3773_s7 + $0x18] sm:$0xff] %v2659_v44   ;;  %v1715_v12 = vadd.f32 %v1714_v51, %v4124_v5  ;;  %v1853_v39 = vmax.f32 %v1821_v45, 0.0 }
 0x35c   : > { %v2974_v37 = vpop.f32.mrf.mxu1  ;;  %v2079_v9 = vmul.f32 %v4155_v34, %v1855_v2  ;;  %v4208_v34 = vpop.f32.mrf.mxu0 }
 0x35d   : > { %2722 = vst [vmem:[%s3773_s7 + $0x10] sm:$0xff] %v2654_v36   ;;  %v1856_v24 = vmax.f32 %v1824_v60, 0.0  ;;  %v1736_v23 = vadd.f32 %v2974_v37, %v4128_v59  ;;  %v1822_v56 = vadd.f32 %v4143_v18, %v1715_v12  ;;  %v2077_v8 = vmul.f32 %v4145_v19, %v1853_v39  ;;  %v2017_v30 = vpop.permute.xlu0 %2016 }
 0x35e   : > { %v1727_v41 = vpop.f32.mrf.mxu1  ;;  %v2938_v54 = vpop.f32.mrf.mxu0 }
 0x35f   : > { %v2080_v5 = vmul.f32 %v4157_v3, %v1856_v24  ;;  %v1827_v42 = vadd.f32 %v4143_v18, %v1736_v23  ;;  %v1728_v11 = vadd.f32 %v1727_v41, %v4132_v6  ;;  %v1854_v46 = vmax.f32 %v1822_v56, 0.0  ;;  %v2002_v3 = vpop.permute.xlu1 %2001 }
 0x360   : > { %v2975_v7 = vpop.f32.mrf.mxu1 }
 0x361   : > { %v2669_v47 = vpack.c.bf16 %v2080_v5, %v2079_v9  ;;  %v1825_v59 = vadd.f32 %v4143_v18, %v1728_v11  ;;  %v1739_v50 = vadd.f32 %v2975_v7, %v4134_v10  ;;  %v2078_v53 = vmul.f32 %v4147_v20, %v1854_v46  ;;  %v2027_v23 = vpop.permute.xlu0 %2026 }
 0x362   : > { %v1730_v48 = vpop.f32.mrf.mxu1  ;;  %v1859_v16 = vmax.f32 %v1827_v42, 0.0 }
 0x363   : > { %2725 = vst [vmem:[%s3773_s7 + $0x28] sm:$0xff] %v2669_v47   ;;  %v1828_v6 = vadd.f32 %v4143_v18, %v1739_v50  ;;  %v1731_v17 = vadd.f32 %v1730_v48, %v4138_v28  ;;  %v2664_v52 = vpack.c.bf16 %v2078_v53, %v2077_v8  ;;  %v1857_v21 = vmax.f32 %v1825_v59, 0.0  ;;  %v2012_v38 = vpop.permute.xlu1 %2011 }
 0x364   : > { %v2978_v57 = vpop.f32.mrf.mxu1  ;;  %v2083_v29 = vmul.f32 %v1982_v49, %v1859_v16 }
 0x365   : > { %v1860_v10 = vmax.f32 %v1828_v6, 0.0  ;;  %v1826_v19 = vadd.f32 %v4143_v18, %v1731_v17  ;;  %v1752_v13 = vadd.f32 %v2978_v57, %v4149_v0  ;;  %2724 = vst [vmem:[%s3773_s7 + $0x20] sm:$0xff] %v2664_v52   ;;  %v2081_v61 = vmul.f32 %v4164_v1, %v1857_v21 }
 0x366   : > { %v1743_v20 = vpop.f32.mrf.mxu1 }
 0x367   : > { %v2084_v26 = vmul.f32 %v1987_v25, %v1860_v10  ;;  %v1858_v58 = vmax.f32 %v1826_v19, 0.0  ;;  %v1744_v32 = vadd.f32 %v1743_v20, %v4153_v33  ;;  %v1831_v27 = vadd.f32 %v4143_v18, %v1752_v13  ;;  %v1566_v25 = vpop.f32.mrf.mxu0 }
 0x368   : > { %v2979_v28 = vpop.f32.mrf.mxu1 }
 0x369   : > { %v2679_v31 = vpack.c.bf16 %v2084_v26, %v2083_v29  ;;  %v2082_v0 = vmul.f32 %v4166_v43, %v1858_v58  ;;  %v1829_v4 = vadd.f32 %v4143_v18, %v1744_v32  ;;  %v1755_v44 = vadd.f32 %v2979_v28, %v4161_v40  ;;  %v2939_v24 = vpop.f32.mrf.mxu0  ;;  %v2022_v40 = vpop.permute.xlu1 %2021 }
 0x36a   : > { %v1746_v49 = vpop.f32.mrf.mxu1  ;;  %v1863_v51 = vmax.f32 %v1831_v27, 0.0 }
 0x36b   : > { %2727 = vst [vmem:[%s3773_s7 + $0x38] sm:$0xff] %v2679_v31   ;;  %v2674_v45 = vpack.c.bf16 %v2082_v0, %v2081_v61  ;;  %v1747_v33 = vadd.f32 %v1746_v49, %v4169_v14  ;;  %v1832_v36 = vadd.f32 %v4143_v18, %v1755_v44  ;;  %v1861_v60 = vmax.f32 %v1829_v4, 0.0  ;;  %v1569_v59 = vpop.f32.mrf.mxu0 }
 0x36c   : > { %v2982_v2 = vpop.f32.mrf.mxu1  ;;  %v2087_v41 = vmul.f32 %v2002_v3, %v1863_v51 }
 0x36d   : > { %2726 = vst [vmem:[%s3773_s7 + $0x30] sm:$0xff] %v2674_v45   ;;  %v1830_v1 = vadd.f32 %v4143_v18, %v1747_v33  ;;  %v1768_v43 = vadd.f32 %v2982_v2, %v4176_v63  ;;  %v1864_v12 = vmax.f32 %v1832_v36, 0.0  ;;  %v2085_v42 = vmul.f32 %v4191_v55, %v1861_v60  ;;  %v2032_v3 = vpop.permute.xlu1 %2031  ;;  %v2942_v6 = vpop.f32.mrf.mxu0 }
 0x36e   : > { %v1759_v37 = vpop.f32.mrf.mxu1 }
 0x36f   : > { %v1862_v39 = vmax.f32 %v1830_v1, 0.0  ;;  %v1835_v56 = vadd.f32 %v4143_v18, %v1768_v43  ;;  %v1760_v14 = vadd.f32 %v1759_v37, %v4186_v35  ;;  %v2088_v9 = vmul.f32 %v2007_v15, %v1864_v12  ;;  %v2037_v15 = vpop.permute.xlu0 %2036  ;;  %v1582_v58 = vpop.f32.mrf.mxu0 }
 0x370   : > { %v2983_v5 = vpop.f32.mrf.mxu1 }
 0x371   : > { %v2086_v11 = vmul.f32 %v4193_v22, %v1862_v39  ;;  %v1771_v63 = vadd.f32 %v2983_v5, %v4198_v62  ;;  %v2689_v46 = vpack.c.bf16 %v2088_v9, %v2087_v41  ;;  %v1833_v7 = vadd.f32 %v4143_v18, %v1760_v14  ;;  %v2042_v27 = vpop.permute.xlu1 %2041 }
 0x372   : > { %v1762_v47 = vpop.f32.mrf.mxu1  ;;  %v1867_v8 = vmax.f32 %v1835_v56, 0.0 }
 0x373   : > { %v2684_v50 = vpack.c.bf16 %v2086_v11, %v2085_v42  ;;  %v1836_v53 = vadd.f32 %v4143_v18, %v1771_v63  ;;  %2729 = vst [vmem:[%s3773_s7 + $0x48] sm:$0xff] %v2689_v46   ;;  %v1763_v35 = vadd.f32 %v1762_v47, %v4208_v34  ;;  %v1865_v16 = vmax.f32 %v1833_v7, 0.0  ;;  %v2047_v28 = vpop.permute.xlu0 %2046 }
 0x374   : > { %v2986_v48 = vpop.f32.mrf.mxu1  ;;  %v2091_v52 = vmul.f32 %v2022_v40, %v1867_v8 }
 0x375   : > { %2728 = vst [vmem:[%s3773_s7 + $0x40] sm:$0xff] %v2684_v50   ;;  %v1868_v55 = vmax.f32 %v1836_v53, 0.0  ;;  %v1784_v22 = vadd.f32 %v2986_v48, %v2938_v54  ;;  %v1834_v62 = vadd.f32 %v4143_v18, %v1763_v35  ;;  %v2089_v26 = vmul.f32 %v2012_v38, %v1865_v16  ;;  %v2943_v38 = vpop.f32.mrf.mxu0  ;;  %v2052_v12 = vpop.permute.xlu1 %2051 }
 0x376   : > { %v1775_v17 = vpop.f32.mrf.mxu1 }
 0x377   : > { %v2092_v57 = vmul.f32 %v2027_v23, %v1868_v55  ;;  %v1839_v21 = vadd.f32 %v4143_v18, %v1784_v22  ;;  %v1776_v10 = vadd.f32 %v1775_v17, %v1566_v25  ;;  %v1866_v19 = vmax.f32 %v1834_v62, 0.0  ;;  %v2057_v37 = vpop.permute.xlu0 %2056  ;;  %v1585_v56 = vpop.f32.mrf.mxu0 }
 0x378   : > { %v2987_v13 = vpop.f32.mrf.mxu1 }
 0x379   : > { %v2699_v34 = vpack.c.bf16 %v2092_v57, %v2091_v52  ;;  %v1837_v20 = vadd.f32 %v4143_v18, %v1776_v10  ;;  %v1787_v29 = vadd.f32 %v2987_v13, %v2939_v24  ;;  %v2090_v54 = vmul.f32 %v2017_v30, %v1866_v19  ;;  %v2062_v47 = vpop.permute.xlu1 %2061 }
 0x37a   : > { %v1778_v32 = vpop.f32.mrf.mxu1  ;;  %v1871_v61 = vmax.f32 %v1839_v21, 0.0 }
 0x37b   : > { %2731 = vst [vmem:[%s3773_s7 + $0x58] sm:$0xff] %v2699_v34   ;;  %v1840_v31 = vadd.f32 %v4143_v18, %v1787_v29  ;;  %v1779_v0 = vadd.f32 %v1778_v32, %v1569_v59  ;;  %v2694_v4 = vpack.c.bf16 %v2090_v54, %v2089_v26  ;;  %v1869_v49 = vmax.f32 %v1837_v20, 0.0  ;;  %v2067_v59 = vpop.permute.xlu0 %2066 }
 0x37c   : > { %v2990_v44 = vpop.f32.mrf.mxu1  ;;  %v2095_v30 = vmul.f32 %v2042_v27, %v1871_v61 }
 0x37d   : > { %v1872_v25 = vmax.f32 %v1840_v31, 0.0  ;;  %v1838_v45 = vadd.f32 %v4143_v18, %v1779_v0  ;;  %v1800_v33 = vadd.f32 %v2990_v44, %v2942_v6  ;;  %2730 = vst [vmem:[%s3773_s7 + $0x50] sm:$0xff] %v2694_v4   ;;  %v2093_v24 = vmul.f32 %v2032_v3, %v1869_v49 }
 0x37e   : > { %v1791_v51 = vpop.f32.mrf.mxu1 }
 0x37f   : > { %v2096_v36 = vmul.f32 %v2047_v28, %v1872_v25  ;;  %v1870_v2 = vmax.f32 %v1838_v45, 0.0  ;;  %v1792_v60 = vadd.f32 %v1791_v51, %v1582_v58  ;;  %v1843_v1 = vadd.f32 %v4143_v18, %v1800_v33 }
 0x380   : > { %v2991_v43 = vpop.f32.mrf.mxu1 }
 0x381   : > { %v2709_v40 = vpack.c.bf16 %v2096_v36, %v2095_v30  ;;  %v2094_v23 = vmul.f32 %v2037_v15, %v1870_v2  ;;  %v1841_v39 = vadd.f32 %v4143_v18, %v1792_v60  ;;  %v1803_v14 = vadd.f32 %v2991_v43, %v2943_v38 }
 0x382   : > { %v1794_v41 = vpop.f32.mrf.mxu1  ;;  %v1875_v42 = vmax.f32 %v1843_v1, 0.0 }
 0x383   : > { %2733 = vst [vmem:[%s3773_s7 + $0x68] sm:$0xff] %v2709_v40   ;;  %v2704_v9 = vpack.c.bf16 %v2094_v23, %v2093_v24  ;;  %v1795_v5 = vadd.f32 %v1794_v41, %v1585_v56  ;;  %v1844_v11 = vadd.f32 %v4143_v18, %v1803_v14  ;;  %v1873_v63 = vmax.f32 %v1841_v39, 0.0 }
 0x384   : > { %v2099_v8 = vmul.f32 %v2062_v47, %v1875_v42 }
 0x385   : > { %2732 = vst [vmem:[%s3773_s7 + $0x60] sm:$0xff] %v2704_v9   ;;  %v1842_v46 = vadd.f32 %v4143_v18, %v1795_v5  ;;  %v1876_v7 = vmax.f32 %v1844_v11, 0.0  ;;  %v2097_v35 = vmul.f32 %v2052_v12, %v1873_v63 }
 0x387   : > { %v1874_v50 = vmax.f32 %v1842_v46, 0.0  ;;  %v2100_v53 = vmul.f32 %v2067_v59, %v1876_v7 }
 0x389   : > { %v2098_v48 = vmul.f32 %v2057_v37, %v1874_v50  ;;  %v2719_v3 = vpack.c.bf16 %v2100_v53, %v2099_v8 }
 0x38b   : > { %v2714_v15 = vpack.c.bf16 %v2098_v48, %v2097_v35  ;;  %2735 = vst [vmem:[%s3773_s7 + $0x78] sm:$0xff] %v2719_v3  }
 0x38d   : > { %2734 = vst [vmem:[%s3773_s7 + $0x70] sm:$0xff] %v2714_v15  }
 0x38e PF: > { %s4407_s19 = sld [smem:[#allocation18_spill]]  ;;  %s2313_s6 = sshll.u32 %s3773_s7, 4  ;;  %s4260_s6 = int_to_ptr.vmem [resolvable:$true] %s2313_s6 }
 0x38f   : > { %s4409_s30 = sld [smem:[#allocation25_spill]]  ;;  %s4264_s22 = scalar_lea.sflag [#allocation6], %s406_s5 }
 0x390   : > { %s4410_s20 = sld [smem:[#allocation32_spill]]  ;;  %s3334_s24 = scalar_lea.vmem %s4260_s6, 2048 }
 0x391   : > { %p3335_p1 = scmp.ne.s32.totalorder %s4260_s6, %s3334_s24  ;;  %s3489_s15 = smov [#allocation10]  }
 0x392   : > { %s3338_s17 = sshll.u32 %s3489_s15, 4  ;;  %s3339_s17 = int_to_ptr.vmem [resolvable:$false] %s3338_s17 }
 0x393   : > { %s3340_s16 = scalar_lea.vmem %s3339_s17, 4096  ;;  %p3341_p3 = scmp.lt.s32.totalorder %s4260_s6, %s3339_s17 }
 0x394   : > { %s2640_s3 = sshll.u32 %s4407_s19, 11  ;;  %p3342_p7 = scmp.lt.s32.totalorder %s3340_s16, %s3334_s24 }
 0x395   : > { %p4411_p5 = scmp.ne.s32.totalorder %s4409_s30, 0 }
 0x396   : > { %s4257_s27 = scalar_lea.hbm %s4410_s20, %s2640_s3  ;;  %p3343_p10 = por %p3342_p7, %p3341_p3 }
 0x397   : > { %p3336_p8 = pnand %p3335_p1, %p4411_p5 }
 0x399   : > { %p3337_p2 = pneg %p3336_p8 }
 0x39b   : > { %p3344_p0 = pnand %p3343_p10, %p3337_p2 }
 0x39d   : > { %3347 = shalt.err (!%p3344_p0)
}
 0x39e   : > { %s3348_s5 = scalar_lea.hbm %s4257_s27, 2048  ;;  %s3352_s7 = scalar_lea.hbm %s4410_s20, 4096 }
 0x39f   : > { %p3349_p12 = scmp.ne.s32.totalorder %s4257_s27, %s3348_s5  ;;  %p3353_p11 = scmp.lt.s32.totalorder %s4257_s27, %s4410_s20 }
 0x3a0   : > { %p3354_p13 = scmp.lt.s32.totalorder %s3352_s7, %s3348_s5 }
 0x3a1   : > { %p3350_p6 = pnand %p3349_p12, %p4411_p5 }
 0x3a2   : > { %p3355_p4 = por %p3354_p13, %p3353_p11 }
 0x3a3   : > { %p3351_p9 = pneg %p3350_p6 }
 0x3a5   : > { %p3356_p1 = pnand %p3355_p4, %p3351_p9 }
 0x3a7   : > { %3359 = shalt.err (!%p3356_p1)
}
 0x3a8   : > { %s3490_s25 = smov 64   ;;  %s3491_s9 = smov 4  }
 0x3a9   : > { %3016 = dma.vmem_to_hbm [thread:$0]  (%p4411_p5), %s4260_s6, 2048, %s4257_s27, %s4264_s22, %s3490_s25, %s3490_s25, %s3491_s9  }
 0x3aa PF: > { %s4412_s0 = sld [smem:[#allocation15_spill]]  ;;  %p3028_p8 = scmp.ge.s32.totalorder %s3478_s13, 2 }
 0x3ab   : > { %s4413_s19 = sld [smem:[#allocation26_spill]] }
 0x3b0   : > { %s2332_s23 = sand.u32 1, %s4412_s0  }
 0x3b1   : > { %p4414_p2 = scmp.ne.s32.totalorder %s4413_s19, 0  ;;  %s2333_s3 = scalar_lea.sflag [#allocation6], %s2332_s23 }
 0x3b3   : > { %p3023_p3 = pnand %p3028_p8, %p4414_p2 }
 0x3b5   : > { %p3024_p7 = pneg %p3023_p3 }
 0x3b7   : > { %3425 = dma.done.wait (%p3024_p7), %s2333_s3, 2048  }
 0x3b8   : > { %3427 = vsyncadd (%p3024_p7), %s2333_s3, 4294965248  ;;  %s27_s13 = sadd.s32 1, %s3478_s13   ;;  %s4416_s24 = sld [smem:[#allocation16_spill]] }
 0x3b9   : > { %p4292_p10 = scmp.ge.s32.totalorder %s27_s13, 6   ;;  %s4417_s30 = sld [smem:[#allocation23_spill]] }
 0x3ba   : > { %s4418_s21 = sld [smem:[#allocation21_spill]]  ;;  %s4423_s25 = smov %s3438_s26 }
 0x3bb   : > { %s4419_s6 = sld [smem:[#allocation22_spill]]  ;;  %s4425_s27 = smov %s3446_s28 }
 0x3bc   : > { %s4420_s22 = sld [smem:[#allocation19_spill]]  ;;  %s4426_s28 = smov %s3450_s29 }
 0x3bd   : > { %s4421_s15 = sld [smem:[#allocation20_spill]]  ;;  %s4430_s9 = smov %s3470_s11 }
 0x3be   : > { %s4431_s10 = smov %s3474_s12 }
 0x3bf   : > { %s4424_s26 = smov %s4417_s30  ;;  %s4428_s30 = smov %s3458_s8 }
 0x3c0   : > { %s4427_s29 = smov %s4418_s21  ;;  %26 = sbr.rel (!%p4292_p10) target bundleno = 20 (0x14), region = 160 }
 0x3c1   : > { %s4429_s8 = smov %s4419_s6 }
 0x3c2   : > { %s4432_s11 = smov %s4420_s22 }
 0x3c3   : > { %s4433_s12 = smov %s4421_s15 }
 0x3c5   :  { %2346 = vsyncpa [#allocation5], 1 }
 0x3c6   :  { %2348 = vsyncpa [#allocation5 + $0x1], 1 }
 0x3c7   :  { %2349 = vsyncpa [#allocation8], 1 }
 0x3c8   :  { %2351 = vsyncpa [#allocation8 + $0x1], 1 }
 0x3c9   :  { %2352 = vsyncpa [#allocation6], 1 }
 0x3ca   :  { %2354 = vsyncpa [#allocation6 + $0x1], 1 }

</bundles_post_ra>
